<compile_context>
chip_gen: v6e
topology: v6e:2x2x1
jax: 0.10.0
libtpu: 0.0.40
codegen_flags: <defaults>
</compile_context>

<pallas_src>
import functools
import math

import jax
import jax.numpy as jnp
from jax.experimental import pallas as pl
from jax.experimental.pallas import tpu as pltpu

LANE = 128


def _round_up(x, m):
    return ((x + m - 1) // m) * m


# ----------------------------------------------------------------------------
# Fused encoder-stack kernel (grid axis = layer index)
# ----------------------------------------------------------------------------
def _make_stack_kernel(S, B, E, H, EP, HP, eps=1e-5):
    BS = B * S
    Dh = E // H
    scale = 1.0 / math.sqrt(Dh)
    inv_E = 1.0 / E

    def layer_norm(y, g, b):
        # Padded columns of y are exactly 0, so full-lane sums equal sums over
        # the real E columns; divide by the real E.  var = E[y^2] - m^2.
        m = jnp.sum(y, axis=-1, keepdims=True) * inv_E
        var = jnp.sum(y * y, axis=-1, keepdims=True) * inv_E - m * m
        return (y - m) * jax.lax.rsqrt(var + eps) * g + b

    def kernel(x_ref,                               # (BS, EP)
               wqkv_ref, bqkv_ref,                  # (EP, 3EP), (1, 3EP)
               wo_ref, bo_ref,                      # (EP, EP),  (1, EP)
               w1_ref, b1_ref,                      # (EP, HP),  (1, HP)
               w2_ref, b2_ref,                      # (HP, EP),  (1, EP)
               g1_ref, be1_ref, g2_ref, be2_ref,    # (1, EP) each
               mu_ref, lv_ref,                      # (B, EP) each
               act_ref):                            # VMEM scratch (BS, EP)
        l = pl.program_id(0)

        @pl.when(l == 0)
        def _():
            act_ref[...] = x_ref[...]

        x = act_ref[...]                                            # (BS, EP)

        # --- QKV projection: one lane-dense MXU matmul ---
        qkv = jnp.dot(x, wqkv_ref[...],
                      preferred_element_type=jnp.float32) + bqkv_ref[...]
        q = qkv[:, 0 * EP:1 * EP]
        k = qkv[:, 1 * EP:2 * EP]
        v = qkv[:, 2 * EP:3 * EP]

        # --- multi-head attention, batched over B; head outputs accumulate
        #     through per-head row blocks of Wo (no concatenates). ---
        proj = jnp.zeros((BS, EP), jnp.float32) + bo_ref[...]
        for h in range(H):
            c0, c1 = h * Dh, (h + 1) * Dh
            qh = q[:, c0:c1].reshape(B, S, Dh)
            kh = k[:, c0:c1].reshape(B, S, Dh)
            vh = v[:, c0:c1].reshape(B, S, Dh)
            sc = jnp.einsum('bqd,bkd->bqk', qh, kh,
                            preferred_element_type=jnp.float32) * scale
            sc = sc - jnp.max(sc, axis=-1, keepdims=True)
            p = jnp.exp(sc)
            p = p * pl.reciprocal(jnp.sum(p, axis=-1, keepdims=True),
                                  approx=True)
            oh = jnp.einsum('bqk,bkd->bqd', p, vh,
                            preferred_element_type=jnp.float32)     # (B,S,Dh)
            proj = proj + jnp.dot(oh.reshape(BS, Dh), wo_ref[c0:c1, :],
                                  preferred_element_type=jnp.float32)

        # --- residual + LayerNorm1 ---
        y = layer_norm(x + proj, g1_ref[...], be1_ref[...])

        # --- FFN (relu) + residual + LayerNorm2 ---
        h1 = jnp.dot(y, w1_ref[...],
                     preferred_element_type=jnp.float32) + b1_ref[...]
        h1 = jnp.maximum(h1, 0.0)
        h2 = jnp.dot(h1, w2_ref[...],
                     preferred_element_type=jnp.float32) + b2_ref[...]
        z = layer_norm(y + h2, g2_ref[...], be2_ref[...])

        act_ref[...] = z   # activation stays resident in VMEM across layers

        # --- emit mu / logvar (seq tokens 0 and 1 of each batch) at the end ---
        @pl.when(l == pl.num_programs(0) - 1)
        def _():
            for b in range(B):
                mu_ref[b:b + 1, :] = z[b * S + 0:b * S + 1, :]
                lv_ref[b:b + 1, :] = z[b * S + 1:b * S + 2, :]

    return kernel


def encoder_stack_pallas(x2d_p, packed, *, S, B, E, H, EP, HP, L):
    BS = B * S
    kernel = _make_stack_kernel(S, B, E, H, EP, HP)

    def w_spec(shape):
        # stacked (L, ...) weight -> per-layer block with the layer dim squeezed
        nd = len(shape) - 1
        return pl.BlockSpec((None,) + tuple(shape[1:]),
                            lambda l, nd=nd: (l,) + (0,) * nd)

    inputs = (
        x2d_p,
        packed['wqkv'], packed['bqkv'],
        packed['wo'], packed['bo'],
        packed['w1'], packed['b1'],
        packed['w2'], packed['b2'],
        packed['g1'], packed['be1'],
        packed['g2'], packed['be2'],
    )
    in_specs = [pl.BlockSpec((BS, EP), lambda l: (0, 0))]
    in_specs += [w_spec(a.shape) for a in inputs[1:]]

    mu, lv = pl.pallas_call(
        kernel,
        out_shape=(jax.ShapeDtypeStruct((B, EP), jnp.float32),
                   jax.ShapeDtypeStruct((B, EP), jnp.float32)),
        grid_spec=pltpu.PrefetchScalarGridSpec(
            num_scalar_prefetch=0,
            grid=(L,),
            in_specs=in_specs,
            out_specs=(pl.BlockSpec((B, EP), lambda l: (0, 0)),
                       pl.BlockSpec((B, EP), lambda l: (0, 0))),
            scratch_shapes=[pltpu.VMEM((BS, EP), jnp.float32)]),
        compiler_params=pltpu.CompilerParams(
            dimension_semantics=("arbitrary",)),   # layers are sequential
    )(*inputs)
    return mu, lv


# ----------------------------------------------------------------------------
# Parameters: synthetic init mirroring the module (kaiming for dim>1 params),
# then padded/stacked into the lane-dense kernel layout.
# ----------------------------------------------------------------------------
def init_raw_params(key, E, HID, L):
    def kaiming(k, shape):
        return jax.random.normal(k, shape, jnp.float32) * math.sqrt(2.0 / shape[1])

    layers = []
    for _ in range(L):
        key, *ks = jax.random.split(key, 9)
        layers.append(dict(
            in_proj_w=kaiming(ks[0], (3 * E, E)),
            in_proj_b=0.1 * jax.random.normal(ks[1], (3 * E,), jnp.float32),
            out_proj_w=kaiming(ks[2], (E, E)),
            out_proj_b=0.1 * jax.random.normal(ks[3], (E,), jnp.float32),
            lin1_w=kaiming(ks[4], (HID, E)),
            lin1_b=0.1 * jax.random.normal(ks[5], (HID,), jnp.float32),
            lin2_w=kaiming(ks[6], (E, HID)),
            lin2_b=0.1 * jax.random.normal(ks[7], (E,), jnp.float32),
            g1=jnp.ones((E,), jnp.float32), be1=jnp.zeros((E,), jnp.float32),
            g2=jnp.ones((E,), jnp.float32), be2=jnp.zeros((E,), jnp.float32),
        ))
    return layers


def pack_params(raw_layers, E, HID, EP, HP):
    def pad2(a, rows, cols):
        return jnp.zeros((rows, cols), jnp.float32).at[:a.shape[0], :a.shape[1]].set(a)

    def pad_row(a, cols):
        return jnp.zeros((1, cols), jnp.float32).at[0, :a.shape[0]].set(a)

    keys = ('wqkv', 'bqkv', 'wo', 'bo', 'w1', 'b1', 'w2', 'b2',
            'g1', 'be1', 'g2', 'be2')
    stacks = {k: [] for k in keys}
    for p in raw_layers:
        wqkv = jnp.zeros((EP, 3 * EP), jnp.float32)
        bqkv = jnp.zeros((1, 3 * EP), jnp.float32)
        for i in range(3):  # q, k, v blocks, each padded to EP lanes
            w_i = p['in_proj_w'][i * E:(i + 1) * E].T        # (E, E), x @ W
            wqkv = wqkv.at[:E, i * EP:i * EP + E].set(w_i)
            bqkv = bqkv.at[0, i * EP:i * EP + E].set(p['in_proj_b'][i * E:(i + 1) * E])
        stacks['wqkv'].append(wqkv)
        stacks['bqkv'].append(bqkv)
        stacks['wo'].append(pad2(p['out_proj_w'].T, EP, EP))
        stacks['bo'].append(pad_row(p['out_proj_b'], EP))
        stacks['w1'].append(pad2(p['lin1_w'].T, EP, HP))
        stacks['b1'].append(pad_row(p['lin1_b'], HP))
        stacks['w2'].append(pad2(p['lin2_w'].T, HP, EP))
        stacks['b2'].append(pad_row(p['lin2_b'], EP))
        stacks['g1'].append(pad_row(p['g1'], EP))   # padded gamma/beta = 0
        stacks['be1'].append(pad_row(p['be1'], EP))
        stacks['g2'].append(pad_row(p['g2'], EP))
        stacks['be2'].append(pad_row(p['be2'], EP))
    return {k: jnp.stack(v, axis=0) for k, v in stacks.items()}


# ----------------------------------------------------------------------------
# TCVAE_Encoder.forward equivalent
# ----------------------------------------------------------------------------
@functools.partial(jax.jit, static_argnames=('S', 'B', 'E', 'H', 'HID', 'L'))
def tcvae_encoder_forward(x_sbe, packed, *, S, B, E, H, HID, L):
    EP = _round_up(E, LANE)
    HP = _round_up(HID, LANE)
    # (S, B, E) -> batch-major token slab (B*S, E), zero-padded to EP lanes
    x2d = jnp.transpose(x_sbe, (1, 0, 2)).reshape(B * S, E)
    x2d_p = jnp.zeros((B * S, EP), jnp.float32).at[:, :E].set(x2d)
    mu_p, lv_p = encoder_stack_pallas(x2d_p, packed,
                                      S=S, B=B, E=E, H=H, EP=EP, HP=HP, L=L)
    return mu_p[:, :E], lv_p[:, :E]


# ----------------------------------------------------------------------------
# Pure-JAX reference (eval-mode post-norm TransformerEncoder) for validation
# ----------------------------------------------------------------------------
def _layer_norm_ref(y, g, b, eps=1e-5):
    m = jnp.mean(y, axis=-1, keepdims=True)
    v = jnp.mean((y - m) ** 2, axis=-1, keepdims=True)
    return (y - m) / jnp.sqrt(v + eps) * g + b


def tcvae_encoder_reference(x_sbe, raw_layers, H):
    HI = jax.lax.Precision.HIGHEST
    S, B, E = x_sbe.shape
    Dh = E // H
    x = x_sbe
    for p in raw_layers:
        qkv = jnp.einsum('sbe,fe->sbf', x, p['in_proj_w'],
                         precision=HI) + p['in_proj_b']
        q, k, v = qkv[..., :E], qkv[..., E:2 * E], qkv[..., 2 * E:]

        def heads(t):
            return t.reshape(S, B * H, Dh).transpose(1, 0, 2)   # (B*H, S, Dh)

        qh, kh, vh = heads(q), heads(k), heads(v)
        sc = jnp.einsum('nqd,nkd->nqk', qh, kh, precision=HI) / math.sqrt(Dh)
        a = jax.nn.softmax(sc, axis=-1)
        oh = jnp.einsum('nqk,nkd->nqd', a, vh, precision=HI)
        o = oh.transpose(1, 0, 2).reshape(S, B, E)
        attn = jnp.einsum('sbe,fe->sbf', o, p['out_proj_w'],
                          precision=HI) + p['out_proj_b']
        x = _layer_norm_ref(x + attn, p['g1'], p['be1'])
        ff = jnp.maximum(jnp.einsum('sbe,he->sbh', x, p['lin1_w'],
                                    precision=HI) + p['lin1_b'], 0.0)
        ff = jnp.einsum('sbh,eh->sbe', ff, p['lin2_w'],
                        precision=HI) + p['lin2_b']
        x = _layer_norm_ref(x + ff, p['g2'], p['be2'])
    return x[0], x[1]


if __name__ == "__main__":
    EMB_DIM, HID_DIM, NUM_HEAD, NUM_LAYER = 32, 64, 4, 2
    S, B = 8, 2

    key = jax.random.PRNGKey(0)
    key, xkey, pkey = jax.random.split(key, 3)
    x = jax.random.normal(xkey, (S, B, EMB_DIM), jnp.float32)

    raw_layers = init_raw_params(pkey, EMB_DIM, HID_DIM, NUM_LAYER)
    EP = _round_up(EMB_DIM, LANE)
    HP = _round_up(HID_DIM, LANE)
    packed = pack_params(raw_layers, EMB_DIM, HID_DIM, EP, HP)

    mu, logvar = tcvae_encoder_forward(
        x, packed, S=S, B=B, E=EMB_DIM, H=NUM_HEAD, HID=HID_DIM, L=NUM_LAYER)
    mu, logvar = jax.block_until_ready((mu, logvar))

    assert mu.shape == (B, EMB_DIM) and logvar.shape == (B, EMB_DIM)
    assert bool(jnp.all(jnp.isfinite(mu))) and bool(jnp.all(jnp.isfinite(logvar)))

    # validate against the pure-JAX eval-mode TransformerEncoder reference
    mu_ref, lv_ref = tcvae_encoder_reference(x, raw_layers, NUM_HEAD)
    err = max(float(jnp.max(jnp.abs(mu - mu_ref))),
              float(jnp.max(jnp.abs(logvar - lv_ref))))
    assert err < 5e-2, f"mismatch vs reference: max abs err = {err}"

    print("KERNEL_OK")
</pallas_src>

<mosaic_0001>
module attributes {stable_mosaic.version = 11 : i64} {
  func.func @kernel(%arg0: i32, %arg1: memref<16x128xf32, #tpu.memory_space<vmem>>, %arg2: memref<1x128x384xf32, #tpu.memory_space<vmem>>, %arg3: memref<1x1x384xf32, #tpu.memory_space<vmem>>, %arg4: memref<1x128x128xf32, #tpu.memory_space<vmem>>, %arg5: memref<1x1x128xf32, #tpu.memory_space<vmem>>, %arg6: memref<1x128x128xf32, #tpu.memory_space<vmem>>, %arg7: memref<1x1x128xf32, #tpu.memory_space<vmem>>, %arg8: memref<1x128x128xf32, #tpu.memory_space<vmem>>, %arg9: memref<1x1x128xf32, #tpu.memory_space<vmem>>, %arg10: memref<1x1x128xf32, #tpu.memory_space<vmem>>, %arg11: memref<1x1x128xf32, #tpu.memory_space<vmem>>, %arg12: memref<1x1x128xf32, #tpu.memory_space<vmem>>, %arg13: memref<1x1x128xf32, #tpu.memory_space<vmem>>, %arg14: memref<2x128xf32, #tpu.memory_space<vmem>>, %arg15: memref<2x128xf32, #tpu.memory_space<vmem>>, %arg16: memref<16x128xf32, #tpu.memory_space<vmem>>) attributes {dimension_semantics = [#tpu.dimension_semantics<arbitrary>], iteration_bounds = array<i64: 2>, scalar_prefetch = 0 : i64, scratch_operands = 1 : i64, tpu.core_type = #tpu.core_type<tc>, window_params = [{pipeline_mode = #tpu.pipeline_mode<synchronous>, transform_indices = @transform_0, window_bounds = array<i64: 16, 128>}, {transform_indices = @transform_1, window_bounds = array<i64: 1, 128, 384>}, {transform_indices = @transform_2, window_bounds = array<i64: 1, 1, 384>}, {transform_indices = @transform_3, window_bounds = array<i64: 1, 128, 128>}, {transform_indices = @transform_4, window_bounds = array<i64: 1, 1, 128>}, {transform_indices = @transform_5, window_bounds = array<i64: 1, 128, 128>}, {transform_indices = @transform_6, window_bounds = array<i64: 1, 1, 128>}, {transform_indices = @transform_7, window_bounds = array<i64: 1, 128, 128>}, {transform_indices = @transform_8, window_bounds = array<i64: 1, 1, 128>}, {transform_indices = @transform_9, window_bounds = array<i64: 1, 1, 128>}, {transform_indices = @transform_10, window_bounds = array<i64: 1, 1, 128>}, {transform_indices = @transform_11, window_bounds = array<i64: 1, 1, 128>}, {transform_indices = @transform_12, window_bounds = array<i64: 1, 1, 128>}, {pipeline_mode = #tpu.pipeline_mode<synchronous>, transform_indices = @transform_13, window_bounds = array<i64: 2, 128>}, {pipeline_mode = #tpu.pipeline_mode<synchronous>, transform_indices = @transform_14, window_bounds = array<i64: 2, 128>}]} {
    %c0_i32 = arith.constant 0 : i32
    %0 = arith.cmpi eq, %arg0, %c0_i32 : i32
    %1 = arith.extui %0 : i1 to i32
    %c0_i32_0 = arith.constant 0 : i32
    %2 = arith.cmpi ne, %1, %c0_i32_0 : i32
    scf.if %2 {
      %c0_85 = arith.constant 0 : index
      %c0_86 = arith.constant 0 : index
      %193 = vector.load %arg1[%c0_85, %c0_86] : memref<16x128xf32, #tpu.memory_space<vmem>>, vector<16x128xf32>
      %c0_87 = arith.constant 0 : index
      %c0_88 = arith.constant 0 : index
      %194 = vector.load %arg16[%c0_87, %c0_88] : memref<16x128xf32, #tpu.memory_space<vmem>>, vector<16x128xf32>
      tpu.vector_store %arg16[%c0_87, %c0_88], %193 {strides = array<i32>} : memref<16x128xf32, #tpu.memory_space<vmem>>, vector<16x128xf32>,
    } else {
    }
    %c0 = arith.constant 0 : index
    %c0_1 = arith.constant 0 : index
    %3 = vector.load %arg16[%c0, %c0_1] : memref<16x128xf32, #tpu.memory_space<vmem>>, vector<16x128xf32>
    %c0_2 = arith.constant 0 : index
    %c0_3 = arith.constant 0 : index
    %c0_4 = arith.constant 0 : index
    %4 = vector.load %arg2[%c0_2, %c0_3, %c0_4] : memref<1x128x384xf32, #tpu.memory_space<vmem>>, vector<1x128x384xf32>
    %5 = vector.shape_cast %4 : vector<1x128x384xf32> to vector<128x384xf32>
    %cst = arith.constant dense<0.000000e+00> : vector<16x384xf32>
    %6 = tpu.matmul %3, %5, %cst {dimension_numbers = #tpu.dot_dimension_numbers<[1], [0], [0], [1], [0, 0, 1, 1], [], []>} : vector<16x128xf32>, vector<128x384xf32>, vector<16x384xf32> -> vector<16x384xf32>
    %c0_5 = arith.constant 0 : index
    %c0_6 = arith.constant 0 : index
    %c0_7 = arith.constant 0 : index
    %7 = vector.load %arg3[%c0_5, %c0_6, %c0_7] : memref<1x1x384xf32, #tpu.memory_space<vmem>>, vector<1x1x384xf32>
    %8 = vector.shape_cast %7 : vector<1x1x384xf32> to vector<1x384xf32>
    %9 = vector.broadcast %8 : vector<1x384xf32> to vector<16x384xf32>
    %10 = arith.addf %6, %9 : vector<16x384xf32>
    %11 = vector.extract_strided_slice %10 {offsets = [0, 0], sizes = [16, 128], strides = [1, 1]} : vector<16x384xf32> to vector<16x128xf32>
    %12 = vector.extract_strided_slice %10 {offsets = [0, 128], sizes = [16, 128], strides = [1, 1]} : vector<16x384xf32> to vector<16x128xf32>
    %13 = vector.extract_strided_slice %10 {offsets = [0, 256], sizes = [16, 128], strides = [1, 1]} : vector<16x384xf32> to vector<16x128xf32>
    %cst_8 = arith.constant 0.000000e+00 : f32
    %14 = vector.broadcast %cst_8 : f32 to vector<16x128xf32>
    %c0_9 = arith.constant 0 : index
    %c0_10 = arith.constant 0 : index
    %c0_11 = arith.constant 0 : index
    %15 = vector.load %arg5[%c0_9, %c0_10, %c0_11] : memref<1x1x128xf32, #tpu.memory_space<vmem>>, vector<1x1x128xf32>
    %16 = vector.shape_cast %15 : vector<1x1x128xf32> to vector<1x128xf32>
    %17 = vector.broadcast %16 : vector<1x128xf32> to vector<16x128xf32>
    %18 = arith.addf %14, %17 : vector<16x128xf32>
    %19 = vector.extract_strided_slice %11 {offsets = [0, 0], sizes = [16, 8], strides = [1, 1]} : vector<16x128xf32> to vector<16x8xf32>
    %20 = vector.shape_cast %19 : vector<16x8xf32> to vector<2x8x8xf32>
    %21 = vector.extract_strided_slice %12 {offsets = [0, 0], sizes = [16, 8], strides = [1, 1]} : vector<16x128xf32> to vector<16x8xf32>
    %22 = vector.shape_cast %21 : vector<16x8xf32> to vector<2x8x8xf32>
    %23 = vector.extract_strided_slice %13 {offsets = [0, 0], sizes = [16, 8], strides = [1, 1]} : vector<16x128xf32> to vector<16x8xf32>
    %24 = vector.shape_cast %23 : vector<16x8xf32> to vector<2x8x8xf32>
    "tpu.trace_start"() <{level = 10 : i32, message = "bqd,bkd->bqk"}> : () -> ()
    %cst_12 = arith.constant dense<0.000000e+00> : vector<2x8x8xf32>
    %25 = tpu.matmul %20, %22, %cst_12 {dimension_numbers = #tpu.dot_dimension_numbers<[2], [2], [1], [1], [0, 0, 0, 1, 1, 1], [0], [0]>} : vector<2x8x8xf32>, vector<2x8x8xf32>, vector<2x8x8xf32> -> vector<2x8x8xf32>
    "tpu.trace_stop"() : () -> ()
    %cst_13 = arith.constant 0.353553385 : f32
    %26 = vector.broadcast %cst_13 : f32 to vector<2x8x8xf32>
    %27 = arith.mulf %25, %26 : vector<2x8x8xf32>
    %cst_14 = arith.constant dense<0xFF800000> : vector<2x8xf32>
    %28 = vector.multi_reduction <maximumf>, %27, %cst_14 [2] : vector<2x8x8xf32> to vector<2x8xf32>
    %29 = vector.shape_cast %28 : vector<2x8xf32> to vector<2x8x1xf32>
    %30 = vector.broadcast %29 : vector<2x8x1xf32> to vector<2x8x8xf32>
    %31 = arith.subf %27, %30 : vector<2x8x8xf32>
    %32 = math.exp %31 : vector<2x8x8xf32>
    %cst_15 = arith.constant dense<0.000000e+00> : vector<2x8xf32>
    %33 = vector.multi_reduction <add>, %32, %cst_15 [2] : vector<2x8x8xf32> to vector<2x8xf32>
    %34 = vector.shape_cast %33 : vector<2x8xf32> to vector<2x8x1xf32>
    %35 = tpu.reciprocal %34 {approx = true} : vector<2x8x1xf32> -> vector<2x8x1xf32>
    %36 = vector.broadcast %35 : vector<2x8x1xf32> to vector<2x8x8xf32>
    %37 = arith.mulf %32, %36 : vector<2x8x8xf32>
    "tpu.trace_start"() <{level = 10 : i32, message = "bqk,bkd->bqd"}> : () -> ()
    %cst_16 = arith.constant dense<0.000000e+00> : vector<2x8x8xf32>
    %38 = tpu.matmul %37, %24, %cst_16 {dimension_numbers = #tpu.dot_dimension_numbers<[2], [1], [1], [2], [0, 0, 0, 1, 1, 2], [0], [0]>} : vector<2x8x8xf32>, vector<2x8x8xf32>, vector<2x8x8xf32> -> vector<2x8x8xf32>
    "tpu.trace_stop"() : () -> ()
    %39 = vector.shape_cast %38 : vector<2x8x8xf32> to vector<16x8xf32>
    %c0_17 = arith.constant 0 : index
    %c0_18 = arith.constant 0 : index
    %c0_19 = arith.constant 0 : index
    %40 = vector.load %arg4[%c0_17, %c0_18, %c0_19] : memref<1x128x128xf32, #tpu.memory_space<vmem>>, vector<1x8x128xf32>
    %41 = vector.shape_cast %40 : vector<1x8x128xf32> to vector<8x128xf32>
    %cst_20 = arith.constant dense<0.000000e+00> : vector<16x128xf32>
    %42 = tpu.matmul %39, %41, %cst_20 {dimension_numbers = #tpu.dot_dimension_numbers<[1], [0], [0], [1], [0, 0, 1, 1], [], []>} : vector<16x8xf32>, vector<8x128xf32>, vector<16x128xf32> -> vector<16x128xf32>
    %43 = arith.addf %18, %42 : vector<16x128xf32>
    %44 = vector.extract_strided_slice %11 {offsets = [0, 8], sizes = [16, 8], strides = [1, 1]} : vector<16x128xf32> to vector<16x8xf32>
    %45 = vector.shape_cast %44 : vector<16x8xf32> to vector<2x8x8xf32>
    %46 = vector.extract_strided_slice %12 {offsets = [0, 8], sizes = [16, 8], strides = [1, 1]} : vector<16x128xf32> to vector<16x8xf32>
    %47 = vector.shape_cast %46 : vector<16x8xf32> to vector<2x8x8xf32>
    %48 = vector.extract_strided_slice %13 {offsets = [0, 8], sizes = [16, 8], strides = [1, 1]} : vector<16x128xf32> to vector<16x8xf32>
    %49 = vector.shape_cast %48 : vector<16x8xf32> to vector<2x8x8xf32>
    "tpu.trace_start"() <{level = 10 : i32, message = "bqd,bkd->bqk"}> : () -> ()
    %cst_21 = arith.constant dense<0.000000e+00> : vector<2x8x8xf32>
    %50 = tpu.matmul %45, %47, %cst_21 {dimension_numbers = #tpu.dot_dimension_numbers<[2], [2], [1], [1], [0, 0, 0, 1, 1, 1], [0], [0]>} : vector<2x8x8xf32>, vector<2x8x8xf32>, vector<2x8x8xf32> -> vector<2x8x8xf32>
    "tpu.trace_stop"() : () -> ()
    %cst_22 = arith.constant 0.353553385 : f32
    %51 = vector.broadcast %cst_22 : f32 to vector<2x8x8xf32>
    %52 = arith.mulf %50, %51 : vector<2x8x8xf32>
    %cst_23 = arith.constant dense<0xFF800000> : vector<2x8xf32>
    %53 = vector.multi_reduction <maximumf>, %52, %cst_23 [2] : vector<2x8x8xf32> to vector<2x8xf32>
    %54 = vector.shape_cast %53 : vector<2x8xf32> to vector<2x8x1xf32>
    %55 = vector.broadcast %54 : vector<2x8x1xf32> to vector<2x8x8xf32>
    %56 = arith.subf %52, %55 : vector<2x8x8xf32>
    %57 = math.exp %56 : vector<2x8x8xf32>
    %cst_24 = arith.constant dense<0.000000e+00> : vector<2x8xf32>
    %58 = vector.multi_reduction <add>, %57, %cst_24 [2] : vector<2x8x8xf32> to vector<2x8xf32>
    %59 = vector.shape_cast %58 : vector<2x8xf32> to vector<2x8x1xf32>
    %60 = tpu.reciprocal %59 {approx = true} : vector<2x8x1xf32> -> vector<2x8x1xf32>
    %61 = vector.broadcast %60 : vector<2x8x1xf32> to vector<2x8x8xf32>
    %62 = arith.mulf %57, %61 : vector<2x8x8xf32>
    "tpu.trace_start"() <{level = 10 : i32, message = "bqk,bkd->bqd"}> : () -> ()
    %cst_25 = arith.constant dense<0.000000e+00> : vector<2x8x8xf32>
    %63 = tpu.matmul %62, %49, %cst_25 {dimension_numbers = #tpu.dot_dimension_numbers<[2], [1], [1], [2], [0, 0, 0, 1, 1, 2], [0], [0]>} : vector<2x8x8xf32>, vector<2x8x8xf32>, vector<2x8x8xf32> -> vector<2x8x8xf32>
    "tpu.trace_stop"() : () -> ()
    %64 = vector.shape_cast %63 : vector<2x8x8xf32> to vector<16x8xf32>
    %c0_26 = arith.constant 0 : index
    %c8 = arith.constant 8 : index
    %c0_27 = arith.constant 0 : index
    %65 = vector.load %arg4[%c0_26, %c8, %c0_27] : memref<1x128x128xf32, #tpu.memory_space<vmem>>, vector<1x8x128xf32>
    %66 = vector.shape_cast %65 : vector<1x8x128xf32> to vector<8x128xf32>
    %cst_28 = arith.constant dense<0.000000e+00> : vector<16x128xf32>
    %67 = tpu.matmul %64, %66, %cst_28 {dimension_numbers = #tpu.dot_dimension_numbers<[1], [0], [0], [1], [0, 0, 1, 1], [], []>} : vector<16x8xf32>, vector<8x128xf32>, vector<16x128xf32> -> vector<16x128xf32>
    %68 = arith.addf %43, %67 : vector<16x128xf32>
    %69 = vector.extract_strided_slice %11 {offsets = [0, 16], sizes = [16, 8], strides = [1, 1]} : vector<16x128xf32> to vector<16x8xf32>
    %70 = vector.shape_cast %69 : vector<16x8xf32> to vector<2x8x8xf32>
    %71 = vector.extract_strided_slice %12 {offsets = [0, 16], sizes = [16, 8], strides = [1, 1]} : vector<16x128xf32> to vector<16x8xf32>
    %72 = vector.shape_cast %71 : vector<16x8xf32> to vector<2x8x8xf32>
    %73 = vector.extract_strided_slice %13 {offsets = [0, 16], sizes = [16, 8], strides = [1, 1]} : vector<16x128xf32> to vector<16x8xf32>
    %74 = vector.shape_cast %73 : vector<16x8xf32> to vector<2x8x8xf32>
    "tpu.trace_start"() <{level = 10 : i32, message = "bqd,bkd->bqk"}> : () -> ()
    %cst_29 = arith.constant dense<0.000000e+00> : vector<2x8x8xf32>
    %75 = tpu.matmul %70, %72, %cst_29 {dimension_numbers = #tpu.dot_dimension_numbers<[2], [2], [1], [1], [0, 0, 0, 1, 1, 1], [0], [0]>} : vector<2x8x8xf32>, vector<2x8x8xf32>, vector<2x8x8xf32> -> vector<2x8x8xf32>
    "tpu.trace_stop"() : () -> ()
    %cst_30 = arith.constant 0.353553385 : f32
    %76 = vector.broadcast %cst_30 : f32 to vector<2x8x8xf32>
    %77 = arith.mulf %75, %76 : vector<2x8x8xf32>
    %cst_31 = arith.constant dense<0xFF800000> : vector<2x8xf32>
    %78 = vector.multi_reduction <maximumf>, %77, %cst_31 [2] : vector<2x8x8xf32> to vector<2x8xf32>
    %79 = vector.shape_cast %78 : vector<2x8xf32> to vector<2x8x1xf32>
    %80 = vector.broadcast %79 : vector<2x8x1xf32> to vector<2x8x8xf32>
    %81 = arith.subf %77, %80 : vector<2x8x8xf32>
    %82 = math.exp %81 : vector<2x8x8xf32>
    %cst_32 = arith.constant dense<0.000000e+00> : vector<2x8xf32>
    %83 = vector.multi_reduction <add>, %82, %cst_32 [2] : vector<2x8x8xf32> to vector<2x8xf32>
    %84 = vector.shape_cast %83 : vector<2x8xf32> to vector<2x8x1xf32>
    %85 = tpu.reciprocal %84 {approx = true} : vector<2x8x1xf32> -> vector<2x8x1xf32>
    %86 = vector.broadcast %85 : vector<2x8x1xf32> to vector<2x8x8xf32>
    %87 = arith.mulf %82, %86 : vector<2x8x8xf32>
    "tpu.trace_start"() <{level = 10 : i32, message = "bqk,bkd->bqd"}> : () -> ()
    %cst_33 = arith.constant dense<0.000000e+00> : vector<2x8x8xf32>
    %88 = tpu.matmul %87, %74, %cst_33 {dimension_numbers = #tpu.dot_dimension_numbers<[2], [1], [1], [2], [0, 0, 0, 1, 1, 2], [0], [0]>} : vector<2x8x8xf32>, vector<2x8x8xf32>, vector<2x8x8xf32> -> vector<2x8x8xf32>
    "tpu.trace_stop"() : () -> ()
    %89 = vector.shape_cast %88 : vector<2x8x8xf32> to vector<16x8xf32>
    %c0_34 = arith.constant 0 : index
    %c16 = arith.constant 16 : index
    %c0_35 = arith.constant 0 : index
    %90 = vector.load %arg4[%c0_34, %c16, %c0_35] : memref<1x128x128xf32, #tpu.memory_space<vmem>>, vector<1x8x128xf32>
    %91 = vector.shape_cast %90 : vector<1x8x128xf32> to vector<8x128xf32>
    %cst_36 = arith.constant dense<0.000000e+00> : vector<16x128xf32>
    %92 = tpu.matmul %89, %91, %cst_36 {dimension_numbers = #tpu.dot_dimension_numbers<[1], [0], [0], [1], [0, 0, 1, 1], [], []>} : vector<16x8xf32>, vector<8x128xf32>, vector<16x128xf32> -> vector<16x128xf32>
    %93 = arith.addf %68, %92 : vector<16x128xf32>
    %94 = vector.extract_strided_slice %11 {offsets = [0, 24], sizes = [16, 8], strides = [1, 1]} : vector<16x128xf32> to vector<16x8xf32>
    %95 = vector.shape_cast %94 : vector<16x8xf32> to vector<2x8x8xf32>
    %96 = vector.extract_strided_slice %12 {offsets = [0, 24], sizes = [16, 8], strides = [1, 1]} : vector<16x128xf32> to vector<16x8xf32>
    %97 = vector.shape_cast %96 : vector<16x8xf32> to vector<2x8x8xf32>
    %98 = vector.extract_strided_slice %13 {offsets = [0, 24], sizes = [16, 8], strides = [1, 1]} : vector<16x128xf32> to vector<16x8xf32>
    %99 = vector.shape_cast %98 : vector<16x8xf32> to vector<2x8x8xf32>
    "tpu.trace_start"() <{level = 10 : i32, message = "bqd,bkd->bqk"}> : () -> ()
    %cst_37 = arith.constant dense<0.000000e+00> : vector<2x8x8xf32>
    %100 = tpu.matmul %95, %97, %cst_37 {dimension_numbers = #tpu.dot_dimension_numbers<[2], [2], [1], [1], [0, 0, 0, 1, 1, 1], [0], [0]>} : vector<2x8x8xf32>, vector<2x8x8xf32>, vector<2x8x8xf32> -> vector<2x8x8xf32>
    "tpu.trace_stop"() : () -> ()
    %cst_38 = arith.constant 0.353553385 : f32
    %101 = vector.broadcast %cst_38 : f32 to vector<2x8x8xf32>
    %102 = arith.mulf %100, %101 : vector<2x8x8xf32>
    %cst_39 = arith.constant dense<0xFF800000> : vector<2x8xf32>
    %103 = vector.multi_reduction <maximumf>, %102, %cst_39 [2] : vector<2x8x8xf32> to vector<2x8xf32>
    %104 = vector.shape_cast %103 : vector<2x8xf32> to vector<2x8x1xf32>
    %105 = vector.broadcast %104 : vector<2x8x1xf32> to vector<2x8x8xf32>
    %106 = arith.subf %102, %105 : vector<2x8x8xf32>
    %107 = math.exp %106 : vector<2x8x8xf32>
    %cst_40 = arith.constant dense<0.000000e+00> : vector<2x8xf32>
    %108 = vector.multi_reduction <add>, %107, %cst_40 [2] : vector<2x8x8xf32> to vector<2x8xf32>
    %109 = vector.shape_cast %108 : vector<2x8xf32> to vector<2x8x1xf32>
    %110 = tpu.reciprocal %109 {approx = true} : vector<2x8x1xf32> -> vector<2x8x1xf32>
    %111 = vector.broadcast %110 : vector<2x8x1xf32> to vector<2x8x8xf32>
    %112 = arith.mulf %107, %111 : vector<2x8x8xf32>
    "tpu.trace_start"() <{level = 10 : i32, message = "bqk,bkd->bqd"}> : () -> ()
    %cst_41 = arith.constant dense<0.000000e+00> : vector<2x8x8xf32>
    %113 = tpu.matmul %112, %99, %cst_41 {dimension_numbers = #tpu.dot_dimension_numbers<[2], [1], [1], [2], [0, 0, 0, 1, 1, 2], [0], [0]>} : vector<2x8x8xf32>, vector<2x8x8xf32>, vector<2x8x8xf32> -> vector<2x8x8xf32>
    "tpu.trace_stop"() : () -> ()
    %114 = vector.shape_cast %113 : vector<2x8x8xf32> to vector<16x8xf32>
    %c0_42 = arith.constant 0 : index
    %c24 = arith.constant 24 : index
    %c0_43 = arith.constant 0 : index
    %115 = vector.load %arg4[%c0_42, %c24, %c0_43] : memref<1x128x128xf32, #tpu.memory_space<vmem>>, vector<1x8x128xf32>
    %116 = vector.shape_cast %115 : vector<1x8x128xf32> to vector<8x128xf32>
    %cst_44 = arith.constant dense<0.000000e+00> : vector<16x128xf32>
    %117 = tpu.matmul %114, %116, %cst_44 {dimension_numbers = #tpu.dot_dimension_numbers<[1], [0], [0], [1], [0, 0, 1, 1], [], []>} : vector<16x8xf32>, vector<8x128xf32>, vector<16x128xf32> -> vector<16x128xf32>
    %118 = arith.addf %93, %117 : vector<16x128xf32>
    %119 = arith.addf %3, %118 : vector<16x128xf32>
    %c0_45 = arith.constant 0 : index
    %c0_46 = arith.constant 0 : index
    %c0_47 = arith.constant 0 : index
    %120 = vector.load %arg10[%c0_45, %c0_46, %c0_47] : memref<1x1x128xf32, #tpu.memory_space<vmem>>, vector<1x1x128xf32>
    %121 = vector.shape_cast %120 : vector<1x1x128xf32> to vector<1x128xf32>
    %c0_48 = arith.constant 0 : index
    %c0_49 = arith.constant 0 : index
    %c0_50 = arith.constant 0 : index
    %122 = vector.load %arg11[%c0_48, %c0_49, %c0_50] : memref<1x1x128xf32, #tpu.memory_space<vmem>>, vector<1x1x128xf32>
    %123 = vector.shape_cast %122 : vector<1x1x128xf32> to vector<1x128xf32>
    %cst_51 = arith.constant dense<0.000000e+00> : vector<16xf32>
    %124 = vector.multi_reduction <add>, %119, %cst_51 [1] : vector<16x128xf32> to vector<16xf32>
    %125 = vector.shape_cast %124 : vector<16xf32> to vector<16x1xf32>
    %cst_52 = arith.constant 3.125000e-02 : f32
    %126 = vector.broadcast %cst_52 : f32 to vector<16x1xf32>
    %127 = arith.mulf %125, %126 : vector<16x1xf32>
    %128 = arith.mulf %119, %119 : vector<16x128xf32>
    %cst_53 = arith.constant dense<0.000000e+00> : vector<16xf32>
    %129 = vector.multi_reduction <add>, %128, %cst_53 [1] : vector<16x128xf32> to vector<16xf32>
    %130 = vector.shape_cast %129 : vector<16xf32> to vector<16x1xf32>
    %cst_54 = arith.constant 3.125000e-02 : f32
    %131 = vector.broadcast %cst_54 : f32 to vector<16x1xf32>
    %132 = arith.mulf %130, %131 : vector<16x1xf32>
    %133 = arith.mulf %127, %127 : vector<16x1xf32>
    %134 = arith.subf %132, %133 : vector<16x1xf32>
    %135 = vector.broadcast %127 : vector<16x1xf32> to vector<16x128xf32>
    %136 = arith.subf %119, %135 : vector<16x128xf32>
    %cst_55 = arith.constant 9.99999974E-6 : f32
    %137 = vector.broadcast %cst_55 : f32 to vector<16x1xf32>
    %138 = arith.addf %134, %137 : vector<16x1xf32>
    %139 = math.rsqrt %138 : vector<16x1xf32>
    %140 = vector.broadcast %139 : vector<16x1xf32> to vector<16x128xf32>
    %141 = arith.mulf %136, %140 : vector<16x128xf32>
    %142 = vector.broadcast %121 : vector<1x128xf32> to vector<16x128xf32>
    %143 = arith.mulf %141, %142 : vector<16x128xf32>
    %144 = vector.broadcast %123 : vector<1x128xf32> to vector<16x128xf32>
    %145 = arith.addf %143, %144 : vector<16x128xf32>
    %c0_56 = arith.constant 0 : index
    %c0_57 = arith.constant 0 : index
    %c0_58 = arith.constant 0 : index
    %146 = vector.load %arg6[%c0_56, %c0_57, %c0_58] : memref<1x128x128xf32, #tpu.memory_space<vmem>>, vector<1x128x128xf32>
    %147 = vector.shape_cast %146 : vector<1x128x128xf32> to vector<128x128xf32>
    %cst_59 = arith.constant dense<0.000000e+00> : vector<16x128xf32>
    %148 = tpu.matmul %145, %147, %cst_59 {dimension_numbers = #tpu.dot_dimension_numbers<[1], [0], [0], [1], [0, 0, 1, 1], [], []>} : vector<16x128xf32>, vector<128x128xf32>, vector<16x128xf32> -> vector<16x128xf32>
    %c0_60 = arith.constant 0 : index
    %c0_61 = arith.constant 0 : index
    %c0_62 = arith.constant 0 : index
    %149 = vector.load %arg7[%c0_60, %c0_61, %c0_62] : memref<1x1x128xf32, #tpu.memory_space<vmem>>, vector<1x1x128xf32>
    %150 = vector.shape_cast %149 : vector<1x1x128xf32> to vector<1x128xf32>
    %151 = vector.broadcast %150 : vector<1x128xf32> to vector<16x128xf32>
    %152 = arith.addf %148, %151 : vector<16x128xf32>
    %cst_63 = arith.constant 0.000000e+00 : f32
    %153 = vector.broadcast %cst_63 : f32 to vector<16x128xf32>
    %154 = arith.maximumf %152, %153 : vector<16x128xf32>
    %c0_64 = arith.constant 0 : index
    %c0_65 = arith.constant 0 : index
    %c0_66 = arith.constant 0 : index
    %155 = vector.load %arg8[%c0_64, %c0_65, %c0_66] : memref<1x128x128xf32, #tpu.memory_space<vmem>>, vector<1x128x128xf32>
    %156 = vector.shape_cast %155 : vector<1x128x128xf32> to vector<128x128xf32>
    %cst_67 = arith.constant dense<0.000000e+00> : vector<16x128xf32>
    %157 = tpu.matmul %154, %156, %cst_67 {dimension_numbers = #tpu.dot_dimension_numbers<[1], [0], [0], [1], [0, 0, 1, 1], [], []>} : vector<16x128xf32>, vector<128x128xf32>, vector<16x128xf32> -> vector<16x128xf32>
    %c0_68 = arith.constant 0 : index
    %c0_69 = arith.constant 0 : index
    %c0_70 = arith.constant 0 : index
    %158 = vector.load %arg9[%c0_68, %c0_69, %c0_70] : memref<1x1x128xf32, #tpu.memory_space<vmem>>, vector<1x1x128xf32>
    %159 = vector.shape_cast %158 : vector<1x1x128xf32> to vector<1x128xf32>
    %160 = vector.broadcast %159 : vector<1x128xf32> to vector<16x128xf32>
    %161 = arith.addf %157, %160 : vector<16x128xf32>
    %162 = arith.addf %145, %161 : vector<16x128xf32>
    %c0_71 = arith.constant 0 : index
    %c0_72 = arith.constant 0 : index
    %c0_73 = arith.constant 0 : index
    %163 = vector.load %arg12[%c0_71, %c0_72, %c0_73] : memref<1x1x128xf32, #tpu.memory_space<vmem>>, vector<1x1x128xf32>
    %164 = vector.shape_cast %163 : vector<1x1x128xf32> to vector<1x128xf32>
    %c0_74 = arith.constant 0 : index
    %c0_75 = arith.constant 0 : index
    %c0_76 = arith.constant 0 : index
    %165 = vector.load %arg13[%c0_74, %c0_75, %c0_76] : memref<1x1x128xf32, #tpu.memory_space<vmem>>, vector<1x1x128xf32>
    %166 = vector.shape_cast %165 : vector<1x1x128xf32> to vector<1x128xf32>
    %cst_77 = arith.constant dense<0.000000e+00> : vector<16xf32>
    %167 = vector.multi_reduction <add>, %162, %cst_77 [1] : vector<16x128xf32> to vector<16xf32>
    %168 = vector.shape_cast %167 : vector<16xf32> to vector<16x1xf32>
    %cst_78 = arith.constant 3.125000e-02 : f32
    %169 = vector.broadcast %cst_78 : f32 to vector<16x1xf32>
    %170 = arith.mulf %168, %169 : vector<16x1xf32>
    %171 = arith.mulf %162, %162 : vector<16x128xf32>
    %cst_79 = arith.constant dense<0.000000e+00> : vector<16xf32>
    %172 = vector.multi_reduction <add>, %171, %cst_79 [1] : vector<16x128xf32> to vector<16xf32>
    %173 = vector.shape_cast %172 : vector<16xf32> to vector<16x1xf32>
    %cst_80 = arith.constant 3.125000e-02 : f32
    %174 = vector.broadcast %cst_80 : f32 to vector<16x1xf32>
    %175 = arith.mulf %173, %174 : vector<16x1xf32>
    %176 = arith.mulf %170, %170 : vector<16x1xf32>
    %177 = arith.subf %175, %176 : vector<16x1xf32>
    %178 = vector.broadcast %170 : vector<16x1xf32> to vector<16x128xf32>
    %179 = arith.subf %162, %178 : vector<16x128xf32>
    %cst_81 = arith.constant 9.99999974E-6 : f32
    %180 = vector.broadcast %cst_81 : f32 to vector<16x1xf32>
    %181 = arith.addf %177, %180 : vector<16x1xf32>
    %182 = math.rsqrt %181 : vector<16x1xf32>
    %183 = vector.broadcast %182 : vector<16x1xf32> to vector<16x128xf32>
    %184 = arith.mulf %179, %183 : vector<16x128xf32>
    %185 = vector.broadcast %164 : vector<1x128xf32> to vector<16x128xf32>
    %186 = arith.mulf %184, %185 : vector<16x128xf32>
    %187 = vector.broadcast %166 : vector<1x128xf32> to vector<16x128xf32>
    %188 = arith.addf %186, %187 : vector<16x128xf32>
    %c0_82 = arith.constant 0 : index
    %c0_83 = arith.constant 0 : index
    %189 = vector.load %arg16[%c0_82, %c0_83] : memref<16x128xf32, #tpu.memory_space<vmem>>, vector<16x128xf32>
    tpu.vector_store %arg16[%c0_82, %c0_83], %188 {strides = array<i32>} : memref<16x128xf32, #tpu.memory_space<vmem>>, vector<16x128xf32>,
    %c1_i32 = arith.constant 1 : i32
    %190 = arith.cmpi eq, %arg0, %c1_i32 : i32
    %191 = arith.extui %190 : i1 to i32
    %c0_i32_84 = arith.constant 0 : i32
    %192 = arith.cmpi ne, %191, %c0_i32_84 : i32
    scf.if %192 {
      %193 = vector.extract_strided_slice %188 {offsets = [0, 0], sizes = [1, 128], strides = [1, 1]} : vector<16x128xf32> to vector<1x128xf32>
      %c0_85 = arith.constant 0 : index
      %c0_86 = arith.constant 0 : index
      %194 = vector.load %arg14[%c0_85, %c0_86] : memref<2x128xf32, #tpu.memory_space<vmem>>, vector<1x128xf32>
      tpu.vector_store %arg14[%c0_85, %c0_86], %193 {strides = array<i32>} : memref<2x128xf32, #tpu.memory_space<vmem>>, vector<1x128xf32>,
      %195 = vector.extract_strided_slice %188 {offsets = [1, 0], sizes = [1, 128], strides = [1, 1]} : vector<16x128xf32> to vector<1x128xf32>
      %c0_87 = arith.constant 0 : index
      %c0_88 = arith.constant 0 : index
      %196 = vector.load %arg15[%c0_87, %c0_88] : memref<2x128xf32, #tpu.memory_space<vmem>>, vector<1x128xf32>
      tpu.vector_store %arg15[%c0_87, %c0_88], %195 {strides = array<i32>} : memref<2x128xf32, #tpu.memory_space<vmem>>, vector<1x128xf32>,
      %197 = vector.extract_strided_slice %188 {offsets = [8, 0], sizes = [1, 128], strides = [1, 1]} : vector<16x128xf32> to vector<1x128xf32>
      %c1 = arith.constant 1 : index
      %c0_89 = arith.constant 0 : index
      %198 = vector.load %arg14[%c1, %c0_89] : memref<2x128xf32, #tpu.memory_space<vmem>>, vector<1x128xf32>
      tpu.vector_store %arg14[%c1, %c0_89], %197 {strides = array<i32>} : memref<2x128xf32, #tpu.memory_space<vmem>>, vector<1x128xf32>,
      %199 = vector.extract_strided_slice %188 {offsets = [9, 0], sizes = [1, 128], strides = [1, 1]} : vector<16x128xf32> to vector<1x128xf32>
      %c1_90 = arith.constant 1 : index
      %c0_91 = arith.constant 0 : index
      %200 = vector.load %arg15[%c1_90, %c0_91] : memref<2x128xf32, #tpu.memory_space<vmem>>, vector<1x128xf32>
      tpu.vector_store %arg15[%c1_90, %c0_91], %199 {strides = array<i32>} : memref<2x128xf32, #tpu.memory_space<vmem>>, vector<1x128xf32>,
    } else {
    }
    return
  }
  func.func @transform_0(%arg0: i32) -> (i32, i32) {
    %c0_i32 = arith.constant 0 : i32
    %c0_i32_0 = arith.constant 0 : i32
    %c0_i32_1 = arith.constant 0 : i32
    return %c0_i32, %c0_i32_0 : i32, i32
  }
  func.func @transform_1(%arg0: i32) -> (i32, i32, i32) {
    %c0_i32 = arith.constant 0 : i32
    %c0_i32_0 = arith.constant 0 : i32
    %c0_i32_1 = arith.constant 0 : i32
    return %arg0, %c0_i32, %c0_i32_0 : i32, i32, i32
  }
  func.func @transform_2(%arg0: i32) -> (i32, i32, i32) {
    %c0_i32 = arith.constant 0 : i32
    %c0_i32_0 = arith.constant 0 : i32
    %c0_i32_1 = arith.constant 0 : i32
    return %arg0, %c0_i32, %c0_i32_0 : i32, i32, i32
  }
  func.func @transform_3(%arg0: i32) -> (i32, i32, i32) {
    %c0_i32 = arith.constant 0 : i32
    %c0_i32_0 = arith.constant 0 : i32
    %c0_i32_1 = arith.constant 0 : i32
    return %arg0, %c0_i32, %c0_i32_0 : i32, i32, i32
  }
  func.func @transform_4(%arg0: i32) -> (i32, i32, i32) {
    %c0_i32 = arith.constant 0 : i32
    %c0_i32_0 = arith.constant 0 : i32
    %c0_i32_1 = arith.constant 0 : i32
    return %arg0, %c0_i32, %c0_i32_0 : i32, i32, i32
  }
  func.func @transform_5(%arg0: i32) -> (i32, i32, i32) {
    %c0_i32 = arith.constant 0 : i32
    %c0_i32_0 = arith.constant 0 : i32
    %c0_i32_1 = arith.constant 0 : i32
    return %arg0, %c0_i32, %c0_i32_0 : i32, i32, i32
  }
  func.func @transform_6(%arg0: i32) -> (i32, i32, i32) {
    %c0_i32 = arith.constant 0 : i32
    %c0_i32_0 = arith.constant 0 : i32
    %c0_i32_1 = arith.constant 0 : i32
    return %arg0, %c0_i32, %c0_i32_0 : i32, i32, i32
  }
  func.func @transform_7(%arg0: i32) -> (i32, i32, i32) {
    %c0_i32 = arith.constant 0 : i32
    %c0_i32_0 = arith.constant 0 : i32
    %c0_i32_1 = arith.constant 0 : i32
    return %arg0, %c0_i32, %c0_i32_0 : i32, i32, i32
  }
  func.func @transform_8(%arg0: i32) -> (i32, i32, i32) {
    %c0_i32 = arith.constant 0 : i32
    %c0_i32_0 = arith.constant 0 : i32
    %c0_i32_1 = arith.constant 0 : i32
    return %arg0, %c0_i32, %c0_i32_0 : i32, i32, i32
  }
  func.func @transform_9(%arg0: i32) -> (i32, i32, i32) {
    %c0_i32 = arith.constant 0 : i32
    %c0_i32_0 = arith.constant 0 : i32
    %c0_i32_1 = arith.constant 0 : i32
    return %arg0, %c0_i32, %c0_i32_0 : i32, i32, i32
  }
  func.func @transform_10(%arg0: i32) -> (i32, i32, i32) {
    %c0_i32 = arith.constant 0 : i32
    %c0_i32_0 = arith.constant 0 : i32
    %c0_i32_1 = arith.constant 0 : i32
    return %arg0, %c0_i32, %c0_i32_0 : i32, i32, i32
  }
  func.func @transform_11(%arg0: i32) -> (i32, i32, i32) {
    %c0_i32 = arith.constant 0 : i32
    %c0_i32_0 = arith.constant 0 : i32
    %c0_i32_1 = arith.constant 0 : i32
    return %arg0, %c0_i32, %c0_i32_0 : i32, i32, i32
  }
  func.func @transform_12(%arg0: i32) -> (i32, i32, i32) {
    %c0_i32 = arith.constant 0 : i32
    %c0_i32_0 = arith.constant 0 : i32
    %c0_i32_1 = arith.constant 0 : i32
    return %arg0, %c0_i32, %c0_i32_0 : i32, i32, i32
  }
  func.func @transform_13(%arg0: i32) -> (i32, i32) {
    %c0_i32 = arith.constant 0 : i32
    %c0_i32_0 = arith.constant 0 : i32
    %c0_i32_1 = arith.constant 0 : i32
    return %c0_i32, %c0_i32_0 : i32, i32
  }
  func.func @transform_14(%arg0: i32) -> (i32, i32) {
    %c0_i32 = arith.constant 0 : i32
    %c0_i32_0 = arith.constant 0 : i32
    %c0_i32_1 = arith.constant 0 : i32
    return %c0_i32, %c0_i32_0 : i32, i32
  }
}

</mosaic_0001>

<bundles_post_ra>
// kernel: tcvae_encoder_forward.1
= control target key start
LH: loop header
LB: loop body
LE: loop exit
PB: predicated region body
PF: predicated region fallthrough
CT: control target
= control target key end

     0   :  { %s4515_s0 = inlined_call_operand.vmem [shape: f32[16,128], index: 0, kind: input, shape index: {}]   ;;  %s4516_s1 = inlined_call_operand.hbm [shape: f32[2,128,384], index: 1, kind: input, shape index: {}]   ;;  %s4517_s2 = inlined_call_operand.vmem [shape: f32[2,1,384], index: 2, kind: input, shape index: {}]   ;;  %s4518_s3 = inlined_call_operand.hbm [shape: f32[2,128,128], index: 3, kind: input, shape index: {}]   ;;  %s4519_s4 = inlined_call_operand.vmem [shape: f32[2,1,128], index: 4, kind: input, shape index: {}]   ;;  %s4520_s5 = inlined_call_operand.hbm [shape: f32[2,128,128], index: 5, kind: input, shape index: {}]   ;;  %s4521_s6 = inlined_call_operand.vmem [shape: f32[2,1,128], index: 6, kind: input, shape index: {}]   ;;  %s4522_s7 = inlined_call_operand.hbm [shape: f32[2,128,128], index: 7, kind: input, shape index: {}]   ;;  %s4523_s8 = inlined_call_operand.vmem [shape: f32[2,1,128], index: 8, kind: input, shape index: {}]   ;;  %s4524_s9 = inlined_call_operand.vmem [shape: f32[2,1,128], index: 9, kind: input, shape index: {}]   ;;  %s4525_s10 = inlined_call_operand.vmem [shape: f32[2,1,128], index: 10, kind: input, shape index: {}]   ;;  %s4526_s11 = inlined_call_operand.vmem [shape: f32[2,1,128], index: 11, kind: input, shape index: {}]   ;;  %s4527_s12 = inlined_call_operand.vmem [shape: f32[2,1,128], index: 12, kind: input, shape index: {}]   ;;  %s4528_s13 = inlined_call_operand.hbm [shape: f32[2,128], index: 13, kind: output, shape index: {0}]   ;;  %s4529_s14 = inlined_call_operand.hbm [shape: f32[2,128], index: 14, kind: output, shape index: {1}]  }
   0x1   :  { %4539 = sst [smem:[#allocation22_spill]] %s4515_s0 }
   0x2   :  { %4540 = sst [smem:[#allocation23_spill]] %s4516_s1 }
   0x3   :  { %4541 = sst [smem:[#allocation24_spill]] %s4518_s3 }
   0x4   :  { %4542 = sst [smem:[#allocation25_spill]] %s4520_s5 }
   0x5   :  { %4543 = sst [smem:[#allocation26_spill]] %s4522_s7 }
   0x6   :  { %4544 = sst [smem:[#allocation27_spill]] %s4526_s11 }
   0x7   :  { %4545 = sst [smem:[#allocation28_spill]] %s4527_s12 }
   0x8   :  { %4546 = sst [smem:[#allocation29_spill]] %s4528_s13 }
   0x9   :  { %4547 = sst [smem:[#allocation30_spill]] %s4529_s14 }
   0xa   :  { %20 = vsyncpa [#allocation4], 0 }
   0xb   :  { %22 = vsyncpa [#allocation4 + $0x1], 0 }
   0xc   :  { %23 = vsyncpa [#allocation7], 0 }
   0xd   :  { %25 = vsyncpa [#allocation7 + $0x1], 0 }
   0xe   :  { %26 = vsyncpa [#allocation10], 0 }
   0xf   :  { %28 = vsyncpa [#allocation10 + $0x1], 0 }
  0x10   :  { %29 = vsyncpa [#allocation5], 0 }
  0x11   :  { %30 = vsyncpa [#allocation13], 0  ;;  %s3910_s29 = smov 0   ;;  %s3912_s30 = smov 0  }
  0x12   :  { %s3914_s15 = smov 0   ;;  %s3916_s16 = smov 0  }
  0x13 LB: > { %4548 = sst [smem:[#allocation19_spill]] %s3814_s15  ;;  %s3929_s17 = sadd.s32 4294967295, %s3818_s16   ;;  %s3818_s16 = sphi %s3916_s16, %s4573_s16   ;;  %s3814_s15 = sphi %s3914_s15, %s4575_s15   ;;  %s3810_s30 = sphi %s3912_s30, %s4577_s30   ;;  %s3806_s29 = sphi %s3910_s29, %s4576_s29  }
  0x14   : > { %s3932_s18 = sadd.s32 1, %s3818_s16   ;;  %s64_s20 = sadd.s32 1, %s3814_s15 }
  0x15   : > { %4549 = sst [smem:[#allocation20_spill]] %s3932_s18  ;;  %s61_s19 = ssub.s32 %s3818_s16, %s3932_s18 }
  0x16   : > { %p62_p0 = scmp.eq.s32.totalorder %s61_s19, 0  ;;  %p71_p1 = scmp.ne.s32.totalorder %s3814_s15, %s3810_s30 }
  0x17   : > { %p72_p2 = scmp.eq.s32.totalorder %s3818_s16, 0  ;;  %p77_p3 = scmp.ne.s32.totalorder %s3810_s30, %s3806_s29 }
  0x18   : > { %s3942_s21 = scalar_select %p62_p0, %s3814_s15, %s64_s20  }
  0x19   : > { %p73_p4 = por %p72_p2, %p71_p1  ;;  %p78_p5 = scmp.eq.s32.totalorder %s3929_s17, 0 }
  0x1a   : > { %4550 = sst [smem:[#allocation21_spill]] %s3942_s21  ;;  %p3520_p6 = scmp.lt.s32.totalorder %s3818_s16, 2 }
  0x1b   : > { %p3946_p7 = por %p78_p5, %p77_p3  ;;  %s3951_s23 = sand.u32 1, %s3814_s15  }
  0x1c   : > { %p3953_p8 = pnand %p3520_p6, %p73_p4  ;;  %s460_s25 = sand.u32 1, %s3818_s16  }
  0x1d   : > { %s4551_s22 = scalar_select %p3946_p7, 1, 0 }
  0x1e   : > { %s3959_s26 = sshll.u32 %s3951_s23, 7  ;;  %s3962_s27 = sshll.u32 %s3818_s16, 11 }
  0x1f   : > { %s464_s28 = scalar_lea.vmem [#allocation6], %s3959_s26  ;;  %s4553_s3 = sld [smem:[#allocation24_spill]] }
  0x20   : > { %s471_s29 = sshll.u32 %s464_s28, 4  ;;  %s3973_s15 = scalar_lea.sflag [#allocation7], %s460_s25  ;;  %s3971_s29 = int_to_ptr.vmem [resolvable:$true] %s471_s29 }
  0x21   : > { %p3979_p10 = pneg %p3953_p8 }
  0x25   : > { %s3969_s21 = scalar_lea.hbm %s4553_s3, %s3962_s27  ;;  %s3613_s20 = scalar_lea.hbm %s4553_s3, 4096 }
  0x26   : > { %s3608_s18 = scalar_lea.hbm %s3969_s21, 2048  ;;  %p3614_p13 = scmp.lt.s32.totalorder %s3969_s21, %s4553_s3 }
  0x27   : > { %p3609_p9 = scmp.ne.s32.totalorder %s3969_s21, %s3608_s18  ;;  %p3615_p0 = scmp.lt.s32.totalorder %s3613_s20, %s3608_s18 }
  0x29   : > { %p3611_p11 = pnand %p3979_p10, %p3609_p9  ;;  %p3616_p1 = por %p3615_p0, %p3614_p13 }
  0x2b   : > { %p3612_p12 = pneg %p3611_p11 }
  0x2d   : > { %p3617_p2 = pnand %p3616_p1, %p3612_p12 }
  0x2f   : > { %3620 = shalt.err (!%p3617_p2)
}
  0x30   : > { %s3621_s25 = scalar_lea.vmem %s3971_s29, 2048  ;;  %s3820_s12 = smov [#allocation6]  }
  0x31   : > { %p3622_p3 = scmp.ne.s32.totalorder %s3971_s29, %s3621_s25  ;;  %s3626_s28 = sshll.u32 %s3820_s12, 4  ;;  %s3627_s28 = int_to_ptr.vmem [resolvable:$false] %s3626_s28 }
  0x32   : > { %s3628_s19 = scalar_lea.vmem %s3627_s28, 4096  ;;  %p3629_p6 = scmp.lt.s32.totalorder %s3971_s29, %s3627_s28 }
  0x33   : > { %p3624_p4 = pnand %p3622_p3, %p3979_p10  ;;  %p3630_p9 = scmp.lt.s32.totalorder %s3628_s19, %s3621_s25 }
  0x35   : > { %p3625_p5 = pneg %p3624_p4  ;;  %p3631_p11 = por %p3630_p9, %p3629_p6 }
  0x37   : > { %p3632_p7 = pnand %p3631_p11, %p3625_p5 }
  0x39   : > { %3635 = shalt.err (!%p3632_p7)
}
  0x3a   : > { %s4535_s0 = smov 128   ;;  %s4537_s13 = smov 8  }
  0x3b   : > { %3513 = dma.hbm_to_vmem [thread:$0]  (!%p3953_p8), %s3969_s21, 2048, %s3971_s29, %s3973_s15, %s4535_s0, %s4535_s0, %s4537_s13  }
  0x3c   : > { %p3130_p12 = scmp.ge.s32.totalorder %s3818_s16, 1  ;;  %p563_p13 = scmp.lt.s32.totalorder %s3818_s16, 3 }
  0x3d   : > { %s3487_s12 = smul.u32 384, %s3951_s23  ;;  %s4556_s1 = sld [smem:[#allocation23_spill]] }
  0x3e   : > { %p4008_p7 = pnand %p3130_p12, %p563_p13  ;;  %s3488_s20 = smul.u32 6144, %s3818_s16 }
  0x3f   : > { %s436_s3 = scalar_lea.vmem [#allocation3], %s3487_s12  ;;  %s433_s21 = scalar_lea.sflag [#allocation4], %s3951_s23 }
  0x40   : > { %s4555_s18 = scalar_select %p4008_p7, 1, 0 }
  0x41   : > { %s443_s11 = sshll.u32 %s436_s3, 4  ;;  %s4018_s11 = int_to_ptr.vmem [resolvable:$true] %s443_s11 }
  0x43   : > { %s4016_s19 = scalar_lea.hbm %s4556_s1, %s3488_s20  ;;  %s3641_s13 = scalar_lea.hbm %s4556_s1, 12288 }
  0x44   : > { %s3636_s29 = scalar_lea.hbm %s4016_s19, 6144  ;;  %p3642_p3 = scmp.lt.s32.totalorder %s4016_s19, %s4556_s1 }
  0x45   : > { %p3637_p0 = scmp.ne.s32.totalorder %s4016_s19, %s3636_s29  ;;  %p3643_p4 = scmp.lt.s32.totalorder %s3641_s13, %s3636_s29 }
  0x47   : > { %p3639_p1 = pnand %p3637_p0, %p3979_p10  ;;  %p3644_p5 = por %p3643_p4, %p3642_p3 }
  0x49   : > { %p3640_p2 = pneg %p3639_p1 }
  0x4b   : > { %p3645_p6 = pnand %p3644_p5, %p3640_p2 }
  0x4d   : > { %3648 = shalt.err (!%p3645_p6)
}
  0x4e   : > { %s3649_s3 = scalar_lea.vmem %s4018_s11, 6144  ;;  %s3823_s12 = smov [#allocation3]  }
  0x4f   : > { %p3650_p9 = scmp.ne.s32.totalorder %s4018_s11, %s3649_s3  ;;  %s3654_s0 = sshll.u32 %s3823_s12, 4  ;;  %s3655_s0 = int_to_ptr.vmem [resolvable:$false] %s3654_s0 }
  0x50   : > { %s3656_s28 = scalar_lea.vmem %s3655_s0, 12288  ;;  %p3657_p13 = scmp.lt.s32.totalorder %s4018_s11, %s3655_s0 }
  0x51   : > { %p3652_p11 = pnand %p3650_p9, %p3979_p10  ;;  %p3658_p0 = scmp.lt.s32.totalorder %s3656_s28, %s3649_s3 }
  0x53   : > { %p3653_p12 = pneg %p3652_p11  ;;  %p3659_p1 = por %p3658_p0, %p3657_p13 }
  0x55   : > { %p3660_p7 = pnand %p3659_p1, %p3653_p12 }
  0x57   : > { %3663 = shalt.err (!%p3660_p7)
}
  0x58   : > { %s3824_s13 = smov 384   ;;  %s3825_s29 = smov 24  }
  0x59   : > { %3510 = dma.hbm_to_vmem [thread:$0]  (!%p3953_p8), %s4016_s19, 6144, %s4018_s11, %s433_s21, %s3824_s13, %s3824_s13, %s3825_s29  }
  0x5a   : > { %s4557_s5 = sld [smem:[#allocation25_spill]]  ;;  %s491_s3 = scalar_lea.vmem [#allocation8], %s3959_s26 }
  0x5b   : > { %s498_s12 = sshll.u32 %s491_s3, 4  ;;  %s499_s12 = int_to_ptr.vmem [resolvable:$true] %s498_s12 }
  0x60   : > { %s4047_s20 = scalar_lea.hbm %s4557_s5, %s3962_s27  ;;  %s3669_s11 = scalar_lea.hbm %s4557_s5, 4096 }
  0x61   : > { %s3664_s0 = scalar_lea.hbm %s4047_s20, 2048  ;;  %p3670_p4 = scmp.lt.s32.totalorder %s4047_s20, %s4557_s5 }
  0x62   : > { %p3665_p7 = scmp.ne.s32.totalorder %s4047_s20, %s3664_s0  ;;  %p3671_p5 = scmp.lt.s32.totalorder %s3669_s11, %s3664_s0 }
  0x64   : > { %p3667_p2 = pnand %p3665_p7, %p3979_p10  ;;  %p3672_p6 = por %p3671_p5, %p3670_p4 }
  0x66   : > { %p3668_p3 = pneg %p3667_p2 }
  0x68   : > { %p3673_p9 = pnand %p3672_p6, %p3668_p3 }
  0x6a   : > { %3676 = shalt.err (!%p3673_p9)
}
  0x6b   : > { %s3677_s13 = scalar_lea.vmem %s499_s12, 2048  ;;  %s3826_s29 = smov [#allocation8]  }
  0x6c   : > { %p3678_p11 = scmp.ne.s32.totalorder %s499_s12, %s3677_s13  ;;  %s3682_s16 = sshll.u32 %s3826_s29, 4  ;;  %s3683_s16 = int_to_ptr.vmem [resolvable:$false] %s3682_s16 }
  0x6d   : > { %s3684_s25 = scalar_lea.vmem %s3683_s16, 4096  ;;  %p3685_p0 = scmp.lt.s32.totalorder %s499_s12, %s3683_s16 }
  0x6e   : > { %p3680_p12 = pnand %p3678_p11, %p3979_p10  ;;  %p3686_p1 = scmp.lt.s32.totalorder %s3684_s25, %s3677_s13 }
  0x70   : > { %p3681_p13 = pneg %p3680_p12  ;;  %p3687_p7 = por %p3686_p1, %p3685_p0 }
  0x72   : > { %p3688_p2 = pnand %p3687_p7, %p3681_p13 }
  0x74   : > { %3691 = shalt.err (!%p3688_p2)
}
  0x75   : > { %s4558_s1 = smov 8   ;;  %s4559_s3 = smov 128  }
  0x76   : > { %3516 = dma.hbm_to_vmem [thread:$0]  (!%p3953_p8), %s4047_s20, 2048, %s499_s12, %s3973_s15, %s4559_s3, %s4559_s3, %s4558_s1  }
  0x77   : > { %s4560_s7 = sld [smem:[#allocation26_spill]]  ;;  %s518_s19 = scalar_lea.vmem [#allocation9], %s3959_s26 }
  0x78   : > { %s525_s21 = sshll.u32 %s518_s19, 4  ;;  %s515_s13 = scalar_lea.sflag [#allocation10], %s3951_s23  ;;  %s4077_s21 = int_to_ptr.vmem [resolvable:$true] %s525_s21 }
  0x7d   : > { %s4074_s11 = scalar_lea.hbm %s4560_s7, %s3962_s27  ;;  %s3697_s20 = scalar_lea.hbm %s4560_s7, 4096 }
  0x7e   : > { %s3692_s29 = scalar_lea.hbm %s4074_s11, 2048  ;;  %p3698_p6 = scmp.lt.s32.totalorder %s4074_s11, %s4560_s7 }
  0x7f   : > { %p3693_p3 = scmp.ne.s32.totalorder %s4074_s11, %s3692_s29  ;;  %p3699_p9 = scmp.lt.s32.totalorder %s3697_s20, %s3692_s29 }
  0x81   : > { %p3695_p4 = pnand %p3693_p3, %p3979_p10  ;;  %p3700_p11 = por %p3699_p9, %p3698_p6 }
  0x83   : > { %p3696_p5 = pneg %p3695_p4 }
  0x85   : > { %p3701_p12 = pnand %p3700_p11, %p3696_p5 }
  0x87   : > { %3704 = shalt.err (!%p3701_p12)
}
  0x88   : > { %s3705_s23 = scalar_lea.vmem %s4077_s21, 2048  ;;  %s3827_s26 = smov [#allocation9]  }
  0x89   : > { %p3706_p13 = scmp.ne.s32.totalorder %s4077_s21, %s3705_s23  ;;  %s3710_s25 = sshll.u32 %s3827_s26, 4  ;;  %s3711_s25 = int_to_ptr.vmem [resolvable:$false] %s3710_s25 }
  0x8a   : > { %s3712_s0 = scalar_lea.vmem %s3711_s25, 4096  ;;  %p3713_p7 = scmp.lt.s32.totalorder %s4077_s21, %s3711_s25 }
  0x8b   : > { %p3708_p0 = pnand %p3706_p13, %p3979_p10  ;;  %p3714_p2 = scmp.lt.s32.totalorder %s3712_s0, %s3705_s23 }
  0x8d   : > { %p3709_p1 = pneg %p3708_p0  ;;  %p3715_p3 = por %p3714_p2, %p3713_p7 }
  0x8f   : > { %p3716_p4 = pnand %p3715_p3, %p3709_p1 }
  0x91   : > { %3719 = shalt.err (!%p3716_p4)
}
  0x92   : > { %3519 = dma.hbm_to_vmem [thread:$0]  (!%p3953_p8), %s4074_s11, 2048, %s4077_s21, %s515_s13, %s4559_s3, %s4559_s3, %s4558_s1  }
  0x93   : > { %p4561_p10 = scmp.ne.s32.totalorder %s4555_s18, 0 }
  0x94   : > { %s569_s14 = sand.u32 (!%p4561_p10), 1, %s3810_s30   ;;  %p4562_p5 = scmp.ne.s32.totalorder (!%p4561_p10), %s4551_s22, 0 }
  0x95   : > { %567 = sbr.rel (%p4561_p10) target bundleno = 4191 (0x105f), region = 72  ;;  %s570_s19 = scalar_lea.sflag (!%p4561_p10), [#allocation4], %s569_s14 }
  0x96   : > { %s3489_s28 = smul.u32 (!%p4561_p10), 384, %s569_s14 }
  0x98   : > { %s4106_s29 = scalar_lea.vmem (!%p4561_p10), [#allocation3], %s3489_s28 }
  0x9a   : > { %3785 = dma.done.wait (%p4562_p5), %s570_s19, 6144  }
  0x9b   : > { %3787 = vsyncadd (%p4562_p5), %s570_s19, 4294961152  ;;  %s578_s24 = sand.u32 1, %s3929_s17   ;;  %s3131_s16 = sshll.u32 %s569_s14, 7 }
  0x9c   : > { %s579_s1 = scalar_lea.sflag [#allocation7], %s578_s24  ;;  %s4113_s3 = scalar_lea.vmem [#allocation6], %s3131_s16 }
  0x9d   : > { %3789 = dma.done.wait (%p4562_p5), %s579_s1, 4096  }
  0x9e   : > { %3791 = vsyncadd (%p4562_p5), %s579_s1, 4294963200  ;;  %s4119_s18 = scalar_lea.vmem [#allocation8], %s3131_s16  ;;  %s597_s11 = scalar_lea.sflag [#allocation10], %s569_s14 }
  0x9f   : > { %s4121_s21 = scalar_lea.vmem [#allocation9], %s3131_s16 }
  0xa0   : > { %3793 = dma.done.wait (%p4562_p5), %s597_s11, 2048  }
  0xa1   : > { %3795 = vsyncadd (%p4562_p5), %s597_s11, 4294965248  ;;  %p680_p8 = scmp.lt.s32.totalorder %s3929_s17, 1  ;;  %s4563_s23 = sld [smem:[#allocation27_spill]] }
  0xa2   : > { %s4564_s0 = sld [smem:[#allocation28_spill]]  ;;  %p3134_p6 = scmp.ne.s32.totalorder %s3929_s17, 0 }
  0xa3   : > { %s4129_s13 = scalar_select %p680_p8, %s3929_s17, 1 }
  0xa4   : > { %708 = sbr.rel (%p3134_p6) target bundleno = 172 (0xac), region = 92  ;;  %s4565_s19 = sld [smem:[#allocation22_spill]] (!%p3134_p6) }
  0xa5   : > { %s3490_s15 = smul.u32 3, %s4129_s13  ;;  %s695_s11 = scalar_lea.vmem %s4524_s9, %s4129_s13 }
  0xa6   : > { %s698_s12 = scalar_lea.vmem %s4525_s10, %s4129_s13 }
  0xa7   : > { %s4147_s24 = scalar_lea.vmem %s4517_s2, %s3490_s15  ;;  %s701_s26 = scalar_lea.vmem %s4563_s23, %s4129_s13 }
  0xa8   : > { %s704_s14 = scalar_lea.vmem %s4564_s0, %s4129_s13 }
  0xaa   : > { %v709_v0 = vld [vmem:[%s4565_s19] sm:$0xff]  ;;  %v710_v1 = vld [vmem:[%s4565_s19 + $0x8] sm:$0xff] }
  0xab   : > { %711 = vst [vmem:[#allocation2] sm:$0xff] %v709_v0  ;;  %712 = vst [vmem:[#allocation2 + $0x8] sm:$0xff] %v710_v1 }
  0xac PF: > { %v761_v2 = vld [vmem:[%s4106_s29 + $0x170] sm:$0xff]  ;;  %v760_v3 = vld [vmem:[%s4106_s29 + $0x168] sm:$0xff]  ;;  %v758_v4 = vld [vmem:[%s4106_s29 + $0x158] sm:$0xff]  ;;  %v3828_v6 = vmov 0.0   ;;  %v765_v53 = vlaneseq  ;;  %vm3829_vm0 = vmmov 0   ;;  %vm940_vm1 = vcmask 64512   ;;  %s4567_s25 = scalar_lea.vmem %s4521_s6, %s4129_s13 }
  0xad   : > { %780 = vmatprep.subr.mxu0 %v761_v2  ;;  %v757_v5 = vld [vmem:[%s4106_s29 + $0x150] sm:$0xff]  ;;  %844 = vmatprep.mubr.f32.mxu0 %v3828_v6  ;;  %v755_v7 = vld [vmem:[%s4106_s29 + $0x140] sm:$0xff]  ;;  %v754_v8 = vld [vmem:[%s4106_s29 + $0x138] sm:$0xff]  ;;  %s3830_s5 = smov 120   ;;  %s3831_s7 = smov 112  }
  0xae   : > { %781 = vmatpush1.msra.mxu0 %v760_v3  ;;  %v752_v9 = vld [vmem:[%s4106_s29 + $0x128] sm:$0xff]  ;;  %v751_v10 = vld [vmem:[%s4106_s29 + $0x120] sm:$0xff]  ;;  %v749_v11 = vld [vmem:[%s4106_s29 + $0x110] sm:$0xff]  ;;  %v766_v54 = vshrl.u32 %v765_v53, 7  ;;  %s3832_s20 = smov 104   ;;  %p3174_p9 = scmp.ne.s32.totalorder %s3929_s17, 1 }
  0xaf   : > { %782 = vmatprep.subr.mxu0 %v758_v4  ;;  %v748_v12 = vld [vmem:[%s4106_s29 + $0x108] sm:$0xff]  ;;  %v746_v13 = vld [vmem:[%s4106_s29 + $0xf8] sm:$0xff]  ;;  %v745_v14 = vld [vmem:[%s4106_s29 + $0xf0] sm:$0xff] }
  0xb0   : > { %783 = vmatpush1.msra.mxu0 %v757_v5  ;;  %v743_v15 = vld [vmem:[%s4106_s29 + $0xe0] sm:$0xff]  ;;  %v742_v17 = vld [vmem:[%s4106_s29 + $0xd8] sm:$0xff]  ;;  %v740_v20 = vld [vmem:[%s4106_s29 + $0xc8] sm:$0xff]  ;;  %v775_v55 = vsub.s32 2, %v766_v54  ;;  %v771_v58 = vsub.s32 1, %v766_v54  ;;  %v767_v59 = vsub.s32 0, %v766_v54 }
  0xb1   : > { %784 = vmatprep.subr.mxu0 %v755_v7  ;;  %v762_v18 = vld [vmem:[%s4106_s29 + $0x178] sm:$0xff]  ;;  %v759_v19 = vld [vmem:[%s4106_s29 + $0x160] sm:$0xff]  ;;  %v756_v22 = vld [vmem:[%s4106_s29 + $0x148] sm:$0xff] }
  0xb2   : > { %785 = vmatpush1.msra.mxu0 %v754_v8  ;;  %v4186_v16 = vld [vmem:[#allocation2] sm:$0xff]  ;;  %3282 = vmatprep.subr.mxu1 %v762_v18  ;;  %v739_v21 = vld [vmem:[%s4106_s29 + $0xc0] sm:$0xff]  ;;  %v736_v24 = vld [vmem:[%s4106_s29 + $0xa8] sm:$0xff] }
  0xb3   : > { %786 = vmatprep.subr.mxu0 %v752_v9  ;;  %3314 = vmatprep.mubr.f32.mxu1 %v4186_v16  ;;  %v737_v23 = vld [vmem:[%s4106_s29 + $0xb0] sm:$0xff]  ;;  %v734_v26 = vld [vmem:[%s4106_s29 + $0x98] sm:$0xff]  ;;  %v731_v29 = vld [vmem:[%s4106_s29 + $0x80] sm:$0xff] }
  0xb4   : > { %787 = vmatpush1.msra.mxu0 %v751_v10  ;;  %3283 = vmatpush3.msra.mxu1 %v762_v18  ;;  %v753_v25 = vld [vmem:[%s4106_s29 + $0x130] sm:$0xff]  ;;  %v750_v28 = vld [vmem:[%s4106_s29 + $0x118] sm:$0xff]  ;;  %v747_v31 = vld [vmem:[%s4106_s29 + $0x100] sm:$0xff] }
  0xb5   : > { %788 = vmatprep.subr.mxu0 %v749_v11  ;;  %3284 = vmatprep.subr.mxu1 %v759_v19  ;;  %v733_v27 = vld [vmem:[%s4106_s29 + $0x90] sm:$0xff]  ;;  %v730_v30 = vld [vmem:[%s4106_s29 + $0x78] sm:$0xff]  ;;  %v728_v32 = vld [vmem:[%s4106_s29 + $0x68] sm:$0xff] }
  0xb6   : > { %789 = vmatpush1.msra.mxu0 %v748_v12  ;;  %3285 = vmatpush3.msra.mxu1 %v759_v19  ;;  %v727_v33 = vld [vmem:[%s4106_s29 + $0x60] sm:$0xff]  ;;  %v744_v34 = vld [vmem:[%s4106_s29 + $0xe8] sm:$0xff]  ;;  %v725_v35 = vld [vmem:[%s4106_s29 + $0x50] sm:$0xff] }
  0xb7   : > { %790 = vmatprep.subr.mxu0 %v746_v13  ;;  %3286 = vmatprep.subr.mxu1 %v756_v22  ;;  %v724_v36 = vld [vmem:[%s4106_s29 + $0x48] sm:$0xff]  ;;  %v741_v37 = vld [vmem:[%s4106_s29 + $0xd0] sm:$0xff]  ;;  %v722_v38 = vld [vmem:[%s4106_s29 + $0x38] sm:$0xff] }
  0xb8   : > { %791 = vmatpush1.msra.mxu0 %v745_v14  ;;  %3287 = vmatpush3.msra.mxu1 %v756_v22  ;;  %v721_v39 = vld [vmem:[%s4106_s29 + $0x30] sm:$0xff]  ;;  %v738_v40 = vld [vmem:[%s4106_s29 + $0xb8] sm:$0xff]  ;;  %v719_v41 = vld [vmem:[%s4106_s29 + $0x20] sm:$0xff] }
  0xb9   : > { %792 = vmatprep.subr.mxu0 %v743_v15  ;;  %3288 = vmatprep.subr.mxu1 %v753_v25  ;;  %v718_v42 = vld [vmem:[%s4106_s29 + $0x18] sm:$0xff]  ;;  %v735_v43 = vld [vmem:[%s4106_s29 + $0xa0] sm:$0xff]  ;;  %v716_v44 = vld [vmem:[%s4106_s29 + $0x8] sm:$0xff] }
  0xba   : > { %793 = vmatpush1.msra.mxu0 %v742_v17  ;;  %3289 = vmatpush3.msra.mxu1 %v753_v25  ;;  %v715_v45 = vld [vmem:[%s4106_s29] sm:$0xff]  ;;  %v732_v46 = vld [vmem:[%s4106_s29 + $0x88] sm:$0xff]  ;;  %v729_v47 = vld [vmem:[%s4106_s29 + $0x70] sm:$0xff] }
  0xbb   : > { %794 = vmatprep.subr.mxu0 %v740_v20  ;;  %3290 = vmatprep.subr.mxu1 %v750_v28  ;;  %v726_v48 = vld [vmem:[%s4106_s29 + $0x58] sm:$0xff]  ;;  %v723_v50 = vld [vmem:[%s4106_s29 + $0x40] sm:$0xff]  ;;  %v720_v51 = vld [vmem:[%s4106_s29 + $0x28] sm:$0xff] }
  0xbc   : > { %795 = vmatpush1.msra.mxu0 %v739_v21  ;;  %3291 = vmatpush3.msra.mxu1 %v750_v28  ;;  %v4223_v49 = vld [vmem:[#allocation2 + $0x8] sm:$0xff]  ;;  %v717_v52 = vld [vmem:[%s4106_s29 + $0x10] sm:$0xff] }
  0xbd   : > { %796 = vmatprep.subr.mxu0 %v737_v23  ;;  %3292 = vmatprep.subr.mxu1 %v747_v31  ;;  %v763_v56 = vld [vmem:[%s4147_s24] sm:$0x7]  ;;  %s4566_s24 = scalar_lea.vmem %s4519_s4, %s4129_s13 }
  0xbe   : > { %797 = vmatpush1.msra.mxu0 %v736_v24  ;;  %3293 = vmatpush3.msra.mxu1 %v747_v31  ;;  %v776_v57 = vrot.slane %v763_v56, %v775_v55  ;;  %v772_v60 = vrot.slane %v763_v56, %v771_v58  ;;  %v768_v62 = vrot.slane %v763_v56, %v767_v59 }
  0xbf   : > { %798 = vmatprep.subr.mxu0 %v734_v26  ;;  %3294 = vmatprep.subr.mxu1 %v744_v34 }
  0xc0   : > { %799 = vmatpush1.msra.mxu0 %v733_v27  ;;  %3295 = vmatpush3.msra.mxu1 %v744_v34 }
  0xc1   : > { %800 = vmatprep.subr.mxu0 %v731_v29  ;;  %3296 = vmatprep.subr.mxu1 %v741_v37 }
  0xc2   : > { %801 = vmatpush1.msra.mxu0 %v730_v30  ;;  %3297 = vmatpush3.msra.mxu1 %v741_v37 }
  0xc3   : > { %802 = vmatprep.subr.mxu0 %v728_v32  ;;  %3298 = vmatprep.subr.mxu1 %v738_v40 }
  0xc4   : > { %803 = vmatpush1.msra.mxu0 %v727_v33  ;;  %3299 = vmatpush3.msra.mxu1 %v738_v40 }
  0xc5   : > { %804 = vmatprep.subr.mxu0 %v725_v35  ;;  %3300 = vmatprep.subr.mxu1 %v735_v43 }
  0xc6   : > { %805 = vmatpush1.msra.mxu0 %v724_v36  ;;  %3301 = vmatpush3.msra.mxu1 %v735_v43 }
  0xc7   : > { %806 = vmatprep.subr.mxu0 %v722_v38  ;;  %3302 = vmatprep.subr.mxu1 %v732_v46 }
  0xc8   : > { %807 = vmatpush1.msra.mxu0 %v721_v39  ;;  %3303 = vmatpush3.msra.mxu1 %v732_v46  ;;  %v1263_v39 = vld [vmem:[%s4113_s3] sm:$0xff] }
  0xc9   : > { %808 = vmatprep.subr.mxu0 %v719_v41  ;;  %3304 = vmatprep.subr.mxu1 %v729_v47 }
  0xca   : > { %809 = vmatpush1.msra.mxu0 %v718_v42  ;;  %3305 = vmatpush3.msra.mxu1 %v729_v47 }
  0xcb   : > { %810 = vmatprep.subr.mxu0 %v716_v44  ;;  %3306 = vmatprep.subr.mxu1 %v726_v48 }
  0xcc   : > { %811 = vmatpush1.msra.mxu0 %v715_v45  ;;  %3307 = vmatpush3.msra.mxu1 %v726_v48 }
  0xcd   : > { %845 = vmatmul.mubr.f32.vlgmr.msra.gmra.mxu0 %v4186_v16  ;;  %3322 = vmatprep.subr.mxu0 %v3828_v6 }
  0xce   : > { %850 = vmatprep.mubr.f32.mxu0 %v3828_v6  ;;  %3308 = vmatprep.subr.mxu1 %v723_v50 }
  0xcf   : > { %3309 = vmatpush3.msra.mxu1 %v723_v50 }
  0xd0   : > { %3310 = vmatprep.subr.mxu1 %v720_v51 }
  0xd1   : > { %851 = vmatmul.mubr.f32.gmra.mxu0 %v4223_v49  ;;  %3311 = vmatpush3.msra.mxu1 %v720_v51 }
  0xd2   : > { %3312 = vmatprep.subr.mxu1 %v717_v52  ;;  %3324 = vmatprep.mubr.msk.f32.mxu0 %vm3829_vm0, %v3828_v6 }
  0xd3   : > { %3313 = vmatpush3.msra.mxu1 %v717_v52 }
  0xd4   : > { %3315 = vmatmul.mubr.f32.vlgmr.msra.gmra.mxu1 %v4223_v49  ;;  %3317 = vmatprep.subr.mxu1 %v3828_v6 }
  0xd5   : > { %3319 = vmatprep.mubr.msk.f32.mxu1 %vm3829_vm0, %v3828_v6 }
 0x18d   : > { %v846_v61 = vpop.f32.mrf.mxu0 }
 0x18e   : > { %v4241_v2 = vadd.f32 %v846_v61, %v768_v62 }
 0x18f   : > { %v848_v63 = vpop.f32.mrf.mxu0 }
 0x190   : > { %v4237_v0 = vadd.f32 %v848_v63, %v772_v60 }
 0x191   : > { %v852_v1 = vpop.f32.mrf.mxu0 }
 0x192   : > { %3318 = vmatpush3.xpose.msk.msra.mxu1 %vm940_vm1, %v4237_v0  ;;  %v4252_v5 = vadd.f32 %v852_v1, %v768_v62 }
 0x193   : > { %v854_v3 = vpop.f32.mrf.mxu0  ;;  %3327 = vmatprep.subr.mxu1 %v3828_v6 }
 0x194   : > { %v4244_v4 = vadd.f32 %v854_v3, %v772_v60  ;;  %v3316_v7 = vpop.f32.mrf.mxu1 }
 0x195   : > { %3320 = vmatmul.mubr.msk.f32.vlgmr.msra.gmra.mxu1 %vm940_vm1, %v4241_v2  ;;  %v4259_v8 = vadd.f32 %v3316_v7, %v776_v57 }
 0x196   : > { %3323 = vmatpush3.xpose.msk.msra.mxu0 %vm940_vm1, %v4244_v4  ;;  %3329 = vmatprep.mubr.msk.f32.mxu1 %vm3829_vm0, %v3828_v6  ;;  %v923_v9 = vpop.f32.mrf.mxu1 }
 0x197   : > { %3332 = vmatprep.subr.mxu0 %v3828_v6  ;;  %v4261_v10 = vadd.f32 %v923_v9, %v776_v57 }
 0x199   : > { %3325 = vmatmul.mubr.msk.f32.vlgmr.msra.gmra.mxu0 %vm940_vm1, %v4252_v5  ;;  %3328 = vmatpush3.msra.mxu1 %v4261_v10 }
 0x19a   : > { %3334 = vmatprep.mubr.msk.f32.mxu0 %vm3829_vm0, %v3828_v6  ;;  %3333 = vmatpush3.msra.mxu0 %v4259_v8 }
 0x19b   : > { %3342 = vmatprep.subr.mxu0 %v3828_v6  ;;  %3337 = vmatprep.subr.mxu1 %v1263_v39 }
 0x255   : > { %v1013_v11 = vpop.f32.mrf.mxu1 }
 0x256   : > { %v1093_v12 = vmul.f32 0.35355338, %v1013_v11 }
 0x257   : > { %v3321_v13 = vpop.f32.mrf.mxu1 }
 0x258   : > { %v1095_v14 = vsel %vm940_vm1, %v1093_v12, -inf }
 0x259   : > { %v1089_v15 = vpop.f32.mrf.mxu0  ;;  %1096 = vmax.xlane.f32.xlu0 %v1095_v14 }
 0x25a   : > { %v1094_v17 = vmul.f32 0.35355338, %v1089_v15 }
 0x25b   : > { %v3326_v18 = vpop.f32.mrf.mxu0 }
 0x25c   : > { %v1098_v19 = vsel %vm940_vm1, %v1094_v17, -inf }
 0x25d   : > { %1099 = vmax.xlane.f32.xlu0 %v1098_v19 }
 0x273   : > { %1349 = vrot.lane.b32.xlu0 %v4237_v0, %s3830_s5 }
 0x2e2   : > { %v1097_v20 = vpop.xlane.xlu0 %1096 }
 0x2e3   : > { %v1101_v21 = vsub.f32 %v1093_v12, %v1097_v20  ;;  %v1681_v20 = vld [vmem:[%s4113_s3 + $0x8] sm:$0xff] }
 0x2e5   : > { %v1103_v22 = vmul.f32 1.442695, %v1101_v21 }
 0x2e6   : > { %v1100_v23 = vpop.xlane.xlu0 %1099 }
 0x2e7   : > { %3568 = vpow2.f32 %v1103_v22  ;;  %v1102_v24 = vsub.f32 %v1094_v17, %v1100_v23 }
 0x2e9   : > { %v1105_v25 = vmul.f32 1.442695, %v1102_v24 }
 0x2ea   : > { %v1350_v37 = vpop.permute.xlu0 %1349 }
 0x2eb   : > { %3570 = vpow2.f32 %v1105_v25 }
 0x2f4   : > { %v3569_v26 = vpop.eup %3568 }
 0x2f5   : > { %v1107_v27 = vsel %vm940_vm1, %v3569_v26, 0.0 }
 0x2f6   : > { %1108 = vadd.xlane.f32.xlu1 %v1107_v27 }
 0x2f8   : > { %v3571_v28 = vpop.eup %3570 }
 0x2f9   : > { %v1110_v29 = vsel %vm940_vm1, %v3571_v28, 0.0 }
 0x2fa   : > { %1111 = vadd.xlane.f32.xlu1 %v1110_v29 }
 0x30b   : > { %1427 = vrot.lane.b32.xlu1 %v4244_v4, %s3830_s5 }
 0x30f   : > { %1347 = vrot.lane.b32.xlu1 %v4241_v2, %s3830_s5 }
 0x313   : > { %1425 = vrot.lane.b32.xlu1 %v4252_v5, %s3830_s5 }
 0x37f   : > { %v1109_v30 = vpop.xlane.xlu1 %1108 }
 0x380   : > { %3572 = vrcp.f32 %v1109_v30 }
 0x383   : > { %v1112_v31 = vpop.xlane.xlu1 %1111 }
 0x384   : > { %3574 = vrcp.f32 %v1112_v31 }
 0x387   : > { %v1428_v35 = vpop.permute.xlu1 %1427 }
 0x38b   : > { %v1348_v38 = vpop.permute.xlu1 %1347 }
 0x38d   : > { %v3573_v32 = vpop.eup %3572 }
 0x38e   : > { %v1115_v33 = vmul.f32 %v3573_v32, %v3569_v26 }
 0x38f   : > { %v1426_v44 = vpop.permute.xlu1 %1425 }
 0x390   : > { %3330 = vmatmul.mubr.msk.f32.vlgmr.msra.gmra.mxu1 %vm940_vm1, %v1115_v33 }
 0x391   : > { %v3575_v34 = vpop.eup %3574  ;;  %3338 = vmatpush3.msra.mxu1 %v1263_v39 }
 0x392   : > { %v1116_v36 = vmul.f32 %v3575_v34, %v3571_v28  ;;  %3347 = vmatprep.subr.mxu1 %v3828_v6 }
 0x394   : > { %3335 = vmatmul.mubr.msk.f32.vlgmr.msra.gmra.mxu0 %vm940_vm1, %v1116_v36  ;;  %v3135_v36 = vld [vmem:[%s4566_s24] ss:$0 sm:$0xff] }
 0x395   : > { %3343 = vmatpush3.xpose.msk.msra.mxu0 %vm940_vm1, %v1350_v37  ;;  %3344 = vmatprep.mubr.msk.f32.mxu0 %vm3829_vm0, %v3828_v6 }
 0x396   : > { %3352 = vmatprep.subr.mxu0 %v3828_v6 }
 0x398   : > { %3345 = vmatmul.mubr.msk.f32.vlgmr.msra.gmra.mxu0 %vm940_vm1, %v1348_v38 }
 0x399   : > { %3354 = vmatprep.mubr.msk.f32.mxu0 %vm3829_vm0, %v3828_v6 }
 0x450   : > { %v1186_v40 = vpop.f32.mrf.mxu1 }
 0x451   : > { %3339 = vmatprep.mubr.msk.f32.mxu1 %vm940_vm1, %v1186_v40 }
 0x452   : > { %v3331_v41 = vpop.f32.mrf.mxu1 }
 0x454   : > { %v1259_v42 = vpop.f32.mrf.mxu0 }
 0x455   : > { %3340 = vmatmul.mubr.msk.f32.vlgmr.msra.gmra.mxu1 %vm940_vm1, %v1259_v42 }
 0x456   : > { %3348 = vmatpush3.xpose.msk.msra.mxu1 %vm940_vm1, %v1428_v35  ;;  %v3336_v43 = vpop.f32.mrf.mxu0  ;;  %3349 = vmatprep.mubr.msk.f32.mxu1 %vm3829_vm0, %v3828_v6 }
 0x457   : > { %3357 = vmatprep.subr.mxu1 %v3828_v6 }
 0x458   : > { %v1421_v45 = vpop.f32.mrf.mxu0 }
 0x459   : > { %v1503_v46 = vmul.f32 0.35355338, %v1421_v45  ;;  %3350 = vmatmul.mubr.msk.f32.vlgmr.msra.gmra.mxu1 %vm940_vm1, %v1426_v44 }
 0x45a   : > { %v3346_v47 = vpop.f32.mrf.mxu0  ;;  %3359 = vmatprep.mubr.msk.f32.mxu1 %vm3829_vm0, %v3828_v6 }
 0x45b   : > { %v1505_v48 = vsel %vm940_vm1, %v1503_v46, -inf }
 0x45c   : > { %1506 = vmax.xlane.f32.xlu0 %v1505_v48 }
 0x4e5   : > { %v1507_v50 = vpop.xlane.xlu0 %1506 }
 0x4e6   : > { %v1511_v51 = vsub.f32 %v1503_v46, %v1507_v50 }
 0x4e8   : > { %v1513_v52 = vmul.f32 1.442695, %v1511_v51 }
 0x4ea   : > { %3576 = vpow2.f32 %v1513_v52 }
 0x4f7   : > { %v3577_v53 = vpop.eup %3576 }
 0x4f8   : > { %v1517_v54 = vsel %vm940_vm1, %v3577_v53, 0.0 }
 0x4f9   : > { %1518 = vadd.xlane.f32.xlu0 %v1517_v54 }
 0x515   : > { %v4300_v55 = vpop.f32.mrf.mxu1 }
 0x516   : > { %v1346_v37 = vadd.f32 %v4300_v55, %v3135_v36 }
 0x517   : > { %v4302_v56 = vpop.f32.mrf.mxu1 }
 0x518   : > { %v1345_v39 = vadd.f32 %v3135_v36, %v4302_v56 }
 0x519   : > { %v1499_v57 = vpop.f32.mrf.mxu1 }
 0x51a   : > { %v1504_v58 = vmul.f32 0.35355338, %v1499_v57 }
 0x51b   : > { %v3351_v59 = vpop.f32.mrf.mxu1 }
 0x51c   : > { %v1508_v60 = vsel %vm940_vm1, %v1504_v58, -inf  ;;  %v2097_v59 = vld [vmem:[%s4113_s3 + $0x10] sm:$0xff] }
 0x51d   : > { %1509 = vmax.xlane.f32.xlu1 %v1508_v60 }
 0x52e   : > { %1605 = vrot.lane.b32.xlu1 %v4259_v8, %s3830_s5 }
 0x532   : > { %1767 = vrot.lane.b32.xlu1 %v4237_v0, %s3831_s7 }
 0x536   : > { %1845 = vrot.lane.b32.xlu1 %v4244_v4, %s3831_s7 }
 0x53a   : > { %1843 = vrot.lane.b32.xlu1 %v4252_v5, %s3831_s7 }
 0x582   : > { %v1519_v9 = vpop.xlane.xlu0 %1518 }
 0x5a6   : > { %v1510_v61 = vpop.xlane.xlu1 %1509 }
 0x5a7   : > { %v1512_v62 = vsub.f32 %v1504_v58, %v1510_v61 }
 0x5a9   : > { %v1515_v63 = vmul.f32 1.442695, %v1512_v62 }
 0x5aa   : > { %v1606_v1 = vpop.permute.xlu1 %1605 }
 0x5ab   : > { %3578 = vpow2.f32 %v1515_v63  ;;  %3358 = vmatpush3.msra.mxu1 %v1606_v1 }
 0x5ac   : > { %3367 = vmatprep.subr.mxu1 %v3828_v6  ;;  %3580 = vrcp.f32 %v1519_v9 }
 0x5ae   : > { %v1768_v18 = vpop.permute.xlu1 %1767 }
 0x5b2   : > { %v1846_v23 = vpop.permute.xlu1 %1845 }
 0x5b6   : > { %v1844_v26 = vpop.permute.xlu1 %1843 }
 0x5b8   : > { %v3579_v3 = vpop.eup %3578 }
 0x5b9   : > { %v1520_v7 = vsel %vm940_vm1, %v3579_v3, 0.0  ;;  %v3581_v12 = vpop.eup %3580 }
 0x5ba   : > { %1521 = vadd.xlane.f32.xlu0 %v1520_v7  ;;  %v1525_v14 = vmul.f32 %v3581_v12, %v3577_v53 }
 0x5d0   : > { %1528 = vrot.lane.b32.xlu0 %v4261_v10, %s3830_s5 }
 0x5d4   : > { %1765 = vrot.lane.b32.xlu0 %v4241_v2, %s3831_s7 }
 0x643   : > { %v1522_v11 = vpop.xlane.xlu0 %1521 }
 0x644   : > { %3582 = vrcp.f32 %v1522_v11 }
 0x647   : > { %v1529_v13 = vpop.permute.xlu0 %1528 }
 0x648   : > { %3353 = vmatpush3.msra.mxu0 %v1529_v13 }
 0x649   : > { %3355 = vmatmul.mubr.msk.f32.vlgmr.msra.gmra.mxu0 %vm940_vm1, %v1525_v14  ;;  %3362 = vmatprep.subr.mxu0 %v1681_v20 }
 0x64a   : > { %3363 = vmatpush3.msra.mxu0 %v1681_v20 }
 0x64b   : > { %v1766_v19 = vpop.permute.xlu0 %1765  ;;  %3372 = vmatprep.subr.mxu0 %v3828_v6 }
 0x651   : > { %v3583_v15 = vpop.eup %3582 }
 0x652   : > { %v1526_v17 = vmul.f32 %v3583_v15, %v3579_v3 }
 0x654   : > { %3360 = vmatmul.mubr.msk.f32.vlgmr.msra.gmra.mxu1 %vm940_vm1, %v1526_v17 }
 0x655   : > { %3368 = vmatpush3.xpose.msk.msra.mxu1 %vm940_vm1, %v1768_v18  ;;  %3369 = vmatprep.mubr.msk.f32.mxu1 %vm3829_vm0, %v3828_v6 }
 0x656   : > { %3377 = vmatprep.subr.mxu1 %v3828_v6 }
 0x658   : > { %3370 = vmatmul.mubr.msk.f32.vlgmr.msra.gmra.mxu1 %vm940_vm1, %v1766_v19 }
 0x659   : > { %3379 = vmatprep.mubr.msk.f32.mxu1 %vm3829_vm0, %v3828_v6 }
 0x709   : > { %v1600_v21 = vpop.f32.mrf.mxu0 }
 0x70a   : > { %3364 = vmatprep.mubr.msk.f32.mxu0 %vm940_vm1, %v1600_v21 }
 0x70b   : > { %v3356_v22 = vpop.f32.mrf.mxu0 }
 0x714   : > { %v1677_v24 = vpop.f32.mrf.mxu1 }
 0x715   : > { %3365 = vmatmul.mubr.msk.f32.vlgmr.msra.gmra.mxu0 %vm940_vm1, %v1677_v24 }
 0x716   : > { %3373 = vmatpush3.xpose.msk.msra.mxu0 %vm940_vm1, %v1846_v23  ;;  %v3361_v25 = vpop.f32.mrf.mxu1  ;;  %3374 = vmatprep.mubr.msk.f32.mxu0 %vm3829_vm0, %v3828_v6 }
 0x717   : > { %3382 = vmatprep.subr.mxu0 %v3828_v6 }
 0x718   : > { %v1839_v27 = vpop.f32.mrf.mxu1 }
 0x719   : > { %v1921_v28 = vmul.f32 0.35355338, %v1839_v27  ;;  %3375 = vmatmul.mubr.msk.f32.vlgmr.msra.gmra.mxu0 %vm940_vm1, %v1844_v26 }
 0x71a   : > { %v3371_v29 = vpop.f32.mrf.mxu1  ;;  %3384 = vmatprep.mubr.msk.f32.mxu0 %vm3829_vm0, %v3828_v6 }
 0x71b   : > { %v1923_v30 = vsel %vm940_vm1, %v1921_v28, -inf }
 0x71c   : > { %1924 = vmax.xlane.f32.xlu0 %v1923_v30 }
 0x7a5   : > { %v1925_v31 = vpop.xlane.xlu0 %1924 }
 0x7a6   : > { %v1929_v32 = vsub.f32 %v1921_v28, %v1925_v31 }
 0x7a8   : > { %v1931_v33 = vmul.f32 1.442695, %v1929_v32 }
 0x7aa   : > { %3584 = vpow2.f32 %v1931_v33 }
 0x7b7   : > { %v3585_v34 = vpop.eup %3584 }
 0x7b8   : > { %v1935_v35 = vsel %vm940_vm1, %v3585_v34, 0.0 }
 0x7b9   : > { %1936 = vadd.xlane.f32.xlu0 %v1935_v35 }
 0x7d5   : > { %v3366_v38 = vpop.f32.mrf.mxu0 }
 0x7d6   : > { %v4348_v40 = vadd.f32 %v3366_v38, %v1346_v37  ;;  %v2513_v38 = vld [vmem:[%s4113_s3 + $0x18] sm:$0xff] }
 0x7d7   : > { %v1754_v41 = vpop.f32.mrf.mxu0 }
 0x7d8   : > { %v4350_v42 = vadd.f32 %v1754_v41, %v1345_v39 }
 0x7d9   : > { %v1917_v43 = vpop.f32.mrf.mxu0 }
 0x7da   : > { %v1922_v44 = vmul.f32 0.35355338, %v1917_v43 }
 0x7db   : > { %v3376_v45 = vpop.f32.mrf.mxu0 }
 0x7dc   : > { %v1926_v46 = vsel %vm940_vm1, %v1922_v44, -inf }
 0x7dd   : > { %1927 = vmax.xlane.f32.xlu1 %v1926_v46 }
 0x7ee   : > { %2021 = vrot.lane.b32.xlu1 %v4259_v8, %s3831_s7 }
 0x7f2   : > { %2183 = vrot.lane.b32.xlu1 %v4237_v0, %s3832_s20 }
 0x7f6   : > { %2261 = vrot.lane.b32.xlu1 %v4244_v4, %s3832_s20 }
 0x7fa   : > { %2259 = vrot.lane.b32.xlu1 %v4252_v5, %s3832_s20 }
 0x842   : > { %v1937_v0 = vpop.xlane.xlu0 %1936 }
 0x866   : > { %v1928_v47 = vpop.xlane.xlu1 %1927 }
 0x867   : > { %v1930_v48 = vsub.f32 %v1922_v44, %v1928_v47 }
 0x869   : > { %v1933_v50 = vmul.f32 1.442695, %v1930_v48 }
 0x86a   : > { %v2022_v51 = vpop.permute.xlu1 %2021 }
 0x86b   : > { %3586 = vpow2.f32 %v1933_v50  ;;  %3383 = vmatpush3.msra.mxu0 %v2022_v51  ;;  %v2656_v51 = vld [vmem:[%s4119_s18 + $0x68] sm:$0xff] }
 0x86c   : > { %3392 = vmatprep.subr.mxu0 %v3828_v6  ;;  %3588 = vrcp.f32 %v1937_v0  ;;  %v2653_v0 = vld [vmem:[%s4119_s18 + $0x50] sm:$0xff] }
 0x86e   : > { %v2184_v58 = vpop.permute.xlu1 %2183 }
 0x872   : > { %v2262_v62 = vpop.permute.xlu1 %2261 }
 0x876   : > { %v2260_v3 = vpop.permute.xlu1 %2259 }
 0x878   : > { %v3587_v52 = vpop.eup %3586 }
 0x879   : > { %v1938_v53 = vsel %vm940_vm1, %v3587_v52, 0.0  ;;  %v3589_v5 = vpop.eup %3588 }
 0x87a   : > { %1939 = vadd.xlane.f32.xlu0 %v1938_v53  ;;  %v1943_v55 = vmul.f32 %v3589_v5, %v3585_v34  ;;  %v2654_v53 = vld [vmem:[%s4119_s18 + $0x58] sm:$0xff]  ;;  %v2651_v5 = vld [vmem:[%s4119_s18 + $0x40] sm:$0xff] }
 0x890   : > { %1945 = vrot.lane.b32.xlu0 %v4261_v10, %s3831_s7 }
 0x894   : > { %2181 = vrot.lane.b32.xlu0 %v4241_v2, %s3832_s20 }
 0x903   : > { %v1940_v4 = vpop.xlane.xlu0 %1939 }
 0x904   : > { %3590 = vrcp.f32 %v1940_v4  ;;  %v2652_v4 = vld [vmem:[%s4119_s18 + $0x48] sm:$0xff] }
 0x907   : > { %v1946_v54 = vpop.permute.xlu0 %1945 }
 0x908   : > { %3378 = vmatpush3.msra.mxu1 %v1946_v54  ;;  %v2650_v54 = vld [vmem:[%s4119_s18 + $0x38] sm:$0xff] }
 0x909   : > { %3380 = vmatmul.mubr.msk.f32.vlgmr.msra.gmra.mxu1 %vm940_vm1, %v1943_v55  ;;  %3387 = vmatprep.subr.mxu1 %v2097_v59  ;;  %v2649_v55 = vld [vmem:[%s4119_s18 + $0x30] sm:$0xff] }
 0x90a   : > { %3388 = vmatpush3.msra.mxu1 %v2097_v59  ;;  %v2644_v59 = vld [vmem:[%s4119_s18 + $0x8] sm:$0xff] }
 0x90b   : > { %v2182_v2 = vpop.permute.xlu0 %2181  ;;  %3397 = vmatprep.subr.mxu1 %v3828_v6 }
 0x911   : > { %v3591_v56 = vpop.eup %3590 }
 0x912   : > { %v1944_v57 = vmul.f32 %v3591_v56, %v3587_v52  ;;  %v2655_v52 = vld [vmem:[%s4119_s18 + $0x60] sm:$0xff]  ;;  %v2648_v56 = vld [vmem:[%s4119_s18 + $0x28] sm:$0xff] }
 0x914   : > { %3385 = vmatmul.mubr.msk.f32.vlgmr.msra.gmra.mxu0 %vm940_vm1, %v1944_v57  ;;  %v2647_v57 = vld [vmem:[%s4119_s18 + $0x20] sm:$0xff] }
 0x915   : > { %3393 = vmatpush3.xpose.msk.msra.mxu0 %vm940_vm1, %v2184_v58  ;;  %3394 = vmatprep.mubr.msk.f32.mxu0 %vm3829_vm0, %v3828_v6  ;;  %v2646_v58 = vld [vmem:[%s4119_s18 + $0x18] sm:$0xff] }
 0x916   : > { %3402 = vmatprep.subr.mxu0 %v3828_v6 }
 0x918   : > { %3395 = vmatmul.mubr.msk.f32.vlgmr.msra.gmra.mxu0 %vm940_vm1, %v2182_v2  ;;  %v2645_v2 = vld [vmem:[%s4119_s18 + $0x10] sm:$0xff] }
 0x919   : > { %3404 = vmatprep.mubr.msk.f32.mxu0 %vm3829_vm0, %v3828_v6 }
 0x9c9   : > { %v2017_v60 = vpop.f32.mrf.mxu1 }
 0x9ca   : > { %3389 = vmatprep.mubr.msk.f32.mxu1 %vm940_vm1, %v2017_v60  ;;  %v2643_v60 = vld [vmem:[%s4119_s18] sm:$0xff] }
 0x9cb   : > { %v3381_v61 = vpop.f32.mrf.mxu1 }
 0x9cc   : > { %v2758_v61 = vld [vmem:[%s4121_s21 + $0x78] sm:$0xff] }
 0x9d4   : > { %v2093_v63 = vpop.f32.mrf.mxu0 }
 0x9d5   : > { %3390 = vmatmul.mubr.msk.f32.vlgmr.msra.gmra.mxu1 %vm940_vm1, %v2093_v63  ;;  %v2756_v63 = vld [vmem:[%s4121_s21 + $0x68] sm:$0xff] }
 0x9d6   : > { %3398 = vmatpush3.xpose.msk.msra.mxu1 %vm940_vm1, %v2262_v62  ;;  %v3386_v1 = vpop.f32.mrf.mxu0  ;;  %3399 = vmatprep.mubr.msk.f32.mxu1 %vm3829_vm0, %v3828_v6  ;;  %v2757_v62 = vld [vmem:[%s4121_s21 + $0x70] sm:$0xff] }
 0x9d7   : > { %3407 = vmatprep.subr.mxu1 %v3828_v6  ;;  %v2755_v1 = vld [vmem:[%s4121_s21 + $0x60] sm:$0xff] }
 0x9d8   : > { %v2255_v7 = vpop.f32.mrf.mxu0 }
 0x9d9   : > { %v2337_v9 = vmul.f32 0.35355338, %v2255_v7  ;;  %3400 = vmatmul.mubr.msk.f32.vlgmr.msra.gmra.mxu1 %vm940_vm1, %v2260_v3  ;;  %v2754_v3 = vld [vmem:[%s4121_s21 + $0x58] sm:$0xff]  ;;  %v2753_v7 = vld [vmem:[%s4121_s21 + $0x50] sm:$0xff] }
 0x9da   : > { %v3396_v11 = vpop.f32.mrf.mxu0  ;;  %3409 = vmatprep.mubr.msk.f32.mxu1 %vm3829_vm0, %v3828_v6 }
 0x9db   : > { %v2339_v12 = vsel %vm940_vm1, %v2337_v9, -inf  ;;  %v2751_v11 = vld [vmem:[%s4121_s21 + $0x40] sm:$0xff] }
 0x9dc   : > { %2340 = vmax.xlane.f32.xlu0 %v2339_v12  ;;  %v2750_v12 = vld [vmem:[%s4121_s21 + $0x38] sm:$0xff] }
 0xa65   : > { %v2341_v13 = vpop.xlane.xlu0 %2340 }
 0xa66   : > { %v2345_v14 = vsub.f32 %v2337_v9, %v2341_v13  ;;  %v2752_v9 = vld [vmem:[%s4121_s21 + $0x48] sm:$0xff]  ;;  %v2749_v13 = vld [vmem:[%s4121_s21 + $0x30] sm:$0xff] }
 0xa68   : > { %v2347_v15 = vmul.f32 1.442695, %v2345_v14  ;;  %v2748_v14 = vld [vmem:[%s4121_s21 + $0x28] sm:$0xff] }
 0xa6a   : > { %3592 = vpow2.f32 %v2347_v15  ;;  %v2747_v15 = vld [vmem:[%s4121_s21 + $0x20] sm:$0xff] }
 0xa77   : > { %v3593_v17 = vpop.eup %3592 }
 0xa78   : > { %v2351_v18 = vsel %vm940_vm1, %v3593_v17, 0.0 }
 0xa79   : > { %2352 = vadd.xlane.f32.xlu0 %v2351_v18 }
 0xa95   : > { %v3391_v19 = vpop.f32.mrf.mxu1 }
 0xa96   : > { %v2180_v20 = vadd.f32 %v3391_v19, %v4348_v40 }
 0xa97   : > { %v2170_v21 = vpop.f32.mrf.mxu1 }
 0xa98   : > { %v2179_v22 = vadd.f32 %v2170_v21, %v4350_v42 }
 0xa99   : > { %v2333_v23 = vpop.f32.mrf.mxu1 }
 0xa9a   : > { %v2338_v24 = vmul.f32 0.35355338, %v2333_v23 }
 0xa9b   : > { %v3401_v6 = vpop.f32.mrf.mxu1 }
 0xa9c   : > { %v2342_v25 = vsel %vm940_vm1, %v2338_v24, -inf }
 0xa9d   : > { %2343 = vmax.xlane.f32.xlu1 %v2342_v25 }
 0xaae   : > { %2437 = vrot.lane.b32.xlu1 %v4259_v8, %s3832_s20 }
 0xb02   : > { %v2353_v32 = vpop.xlane.xlu0 %2352 }
 0xb26   : > { %v2344_v26 = vpop.xlane.xlu1 %2343 }
 0xb27   : > { %v2346_v27 = vsub.f32 %v2338_v24, %v2344_v26 }
 0xb29   : > { %v2349_v28 = vmul.f32 1.442695, %v2346_v27 }
 0xb2a   : > { %v2438_v29 = vpop.permute.xlu1 %2437 }
 0xb2b   : > { %3594 = vpow2.f32 %v2349_v28  ;;  %3408 = vmatpush3.msra.mxu1 %v2438_v29 }
 0xb2c   : > { %3596 = vrcp.f32 %v2353_v32  ;;  %v3168_v32 = vld [vmem:[%s695_s11] ss:$0 sm:$0xff] }
 0xb38   : > { %v3595_v30 = vpop.eup %3594 }
 0xb39   : > { %v2354_v31 = vsel %vm940_vm1, %v3595_v30, 0.0  ;;  %v3597_v34 = vpop.eup %3596 }
 0xb3a   : > { %2355 = vadd.xlane.f32.xlu0 %v2354_v31  ;;  %v2359_v35 = vmul.f32 %v3597_v34, %v3593_v17 }
 0xb50   : > { %2361 = vrot.lane.b32.xlu0 %v4261_v10, %s3832_s20 }
 0xbc3   : > { %v2356_v33 = vpop.xlane.xlu0 %2355 }
 0xbc4   : > { %3598 = vrcp.f32 %v2356_v33 }
 0xbc7   : > { %v2362_v8 = vpop.permute.xlu0 %2361 }
 0xbc8   : > { %3403 = vmatpush3.msra.mxu0 %v2362_v8 }
 0xbc9   : > { %3405 = vmatmul.mubr.msk.f32.vlgmr.msra.gmra.mxu0 %vm940_vm1, %v2359_v35  ;;  %3412 = vmatprep.subr.mxu0 %v2513_v38  ;;  %v3169_v35 = vld [vmem:[%s698_s12] ss:$0 sm:$0xff] }
 0xbca   : > { %3413 = vmatpush3.msra.mxu0 %v2513_v38 }
 0xbcb   : > { %3452 = vmatprep.subr.mxu0 %v2758_v61 }
 0xbd1   : > { %v3599_v36 = vpop.eup %3598 }
 0xbd2   : > { %v2360_v37 = vmul.f32 %v3599_v36, %v3595_v30 }
 0xbd4   : > { %3410 = vmatmul.mubr.msk.f32.vlgmr.msra.gmra.mxu1 %vm940_vm1, %v2360_v37 }
 0xc89   : > { %v2433_v39 = vpop.f32.mrf.mxu0 }
 0xc8a   : > { %3414 = vmatprep.mubr.msk.f32.mxu0 %vm940_vm1, %v2433_v39 }
 0xc8b   : > { %v3406_v10 = vpop.f32.mrf.mxu0 }
 0xc94   : > { %v2509_v40 = vpop.f32.mrf.mxu1 }
 0xc95   : > { %3415 = vmatmul.mubr.msk.f32.vlgmr.msra.gmra.mxu0 %vm940_vm1, %v2509_v40  ;;  %v2746_v40 = vld [vmem:[%s4121_s21 + $0x18] sm:$0xff] }
 0xc96   : > { %v3411_v41 = vpop.f32.mrf.mxu1  ;;  %3453 = vmatpush3.msra.mxu0 %v2758_v61 }
 0xc97   : > { %3454 = vmatprep.subr.mxu0 %v2757_v62  ;;  %v2745_v41 = vld [vmem:[%s4121_s21 + $0x10] sm:$0xff] }
 0xc98   : > { %3455 = vmatpush3.msra.mxu0 %v2757_v62 }
 0xc99   : > { %3456 = vmatprep.subr.mxu0 %v2756_v63 }
 0xc9a   : > { %3457 = vmatpush3.msra.mxu0 %v2756_v63 }
 0xc9b   : > { %3458 = vmatprep.subr.mxu0 %v2755_v1 }
 0xc9c   : > { %3459 = vmatpush3.msra.mxu0 %v2755_v1 }
 0xc9d   : > { %3460 = vmatprep.subr.mxu0 %v2754_v3 }
 0xc9e   : > { %3461 = vmatpush3.msra.mxu0 %v2754_v3 }
 0xc9f   : > { %3462 = vmatprep.subr.mxu0 %v2753_v7 }
 0xca0   : > { %3463 = vmatpush3.msra.mxu0 %v2753_v7 }
 0xca1   : > { %3464 = vmatprep.subr.mxu0 %v2752_v9 }
 0xca2   : > { %3465 = vmatpush3.msra.mxu0 %v2752_v9 }
 0xca3   : > { %3466 = vmatprep.subr.mxu0 %v2751_v11 }
 0xca4   : > { %3467 = vmatpush3.msra.mxu0 %v2751_v11 }
 0xca5   : > { %3468 = vmatprep.subr.mxu0 %v2750_v12 }
 0xca6   : > { %3469 = vmatpush3.msra.mxu0 %v2750_v12 }
 0xca7   : > { %3470 = vmatprep.subr.mxu0 %v2749_v13 }
 0xca8   : > { %3471 = vmatpush3.msra.mxu0 %v2749_v13 }
 0xca9   : > { %3472 = vmatprep.subr.mxu0 %v2748_v14 }
 0xcaa   : > { %3473 = vmatpush3.msra.mxu0 %v2748_v14  ;;  %v3172_v14 = vld [vmem:[%s701_s26] ss:$0 sm:$0xff] }
 0xcab   : > { %3474 = vmatprep.subr.mxu0 %v2747_v15 }
 0xcac   : > { %3475 = vmatpush3.msra.mxu0 %v2747_v15 }
 0xcad   : > { %3476 = vmatprep.subr.mxu0 %v2746_v40 }
 0xcae   : > { %3477 = vmatpush3.msra.mxu0 %v2746_v40 }
 0xcaf   : > { %3478 = vmatprep.subr.mxu0 %v2745_v41 }
 0xcb0   : > { %3479 = vmatpush3.msra.mxu0 %v2745_v41 }
 0xd55   : > { %v3416_v42 = vpop.f32.mrf.mxu0 }
 0xd56   : > { %v2596_v43 = vadd.f32 %v3416_v42, %v2180_v20  ;;  %v2744_v42 = vld [vmem:[%s4121_s21 + $0x8] sm:$0xff] }
 0xd57   : > { %v2586_v44 = vpop.f32.mrf.mxu0  ;;  %3480 = vmatprep.subr.mxu0 %v2744_v42 }
 0xd58   : > { %v4403_v45 = vadd.f32 %v2596_v43, %v4223_v49  ;;  %v2595_v46 = vadd.f32 %v2586_v44, %v2179_v22  ;;  %v2658_v49 = vld [vmem:[%s4119_s18 + $0x78] sm:$0xff]  ;;  %v2743_v43 = vld [vmem:[%s4121_s21] sm:$0xff]  ;;  %3481 = vmatpush3.msra.mxu0 %v2744_v42  ;;  %v3170_v44 = vld [vmem:[%s4567_s25] ss:$0 sm:$0xff]  ;;  %s4568_s21 = scalar_lea.vmem %s4523_s8, %s4129_s13 }
 0xd59   : > { %3417 = vmatprep.subr.mxu1 %v2658_v49  ;;  %3482 = vmatprep.subr.mxu0 %v2743_v43 }
 0xd5a   : > { %v4406_v47 = vadd.f32 %v2595_v46, %v4186_v16  ;;  %2603 = vadd.xlane.f32.xlu0 %v4403_v45  ;;  %v2608_v50 = vmul.f32 %v4403_v45, %v4403_v45  ;;  %3418 = vmatpush3.msra.mxu1 %v2658_v49  ;;  %v2657_v16 = vld [vmem:[%s4119_s18 + $0x70] sm:$0xff] }
 0xd5b   : > { %3419 = vmatprep.subr.mxu1 %v2657_v16  ;;  %3483 = vmatpush3.msra.mxu0 %v2743_v43 }
 0xd5c   : > { %2601 = vadd.xlane.f32.xlu1 %v4406_v47  ;;  %v2607_v48 = vmul.f32 %v4406_v47, %v4406_v47  ;;  %3420 = vmatpush3.msra.mxu1 %v2657_v16  ;;  %v3171_v16 = vld [vmem:[%s4568_s21] ss:$0 sm:$0xff] }
 0xd5d   : > { %3421 = vmatprep.subr.mxu1 %v2656_v51 }
 0xd5e   : > { %2609 = vadd.xlane.f32.xlu0 %v2607_v48  ;;  %3422 = vmatpush3.msra.mxu1 %v2656_v51 }
 0xd5f   : > { %3423 = vmatprep.subr.mxu1 %v2655_v52 }
 0xd60   : > { %2611 = vadd.xlane.f32.xlu1 %v2608_v50  ;;  %3424 = vmatpush3.msra.mxu1 %v2655_v52 }
 0xd61   : > { %3425 = vmatprep.subr.mxu1 %v2654_v53 }
 0xd62   : > { %3426 = vmatpush3.msra.mxu1 %v2654_v53 }
 0xd63   : > { %3427 = vmatprep.subr.mxu1 %v2653_v0 }
 0xd64   : > { %3428 = vmatpush3.msra.mxu1 %v2653_v0 }
 0xd65   : > { %3429 = vmatprep.subr.mxu1 %v2652_v4 }
 0xd66   : > { %3430 = vmatpush3.msra.mxu1 %v2652_v4 }
 0xd67   : > { %3431 = vmatprep.subr.mxu1 %v2651_v5 }
 0xd68   : > { %3432 = vmatpush3.msra.mxu1 %v2651_v5 }
 0xd69   : > { %3433 = vmatprep.subr.mxu1 %v2650_v54 }
 0xd6a   : > { %3434 = vmatpush3.msra.mxu1 %v2650_v54 }
 0xd6b   : > { %3435 = vmatprep.subr.mxu1 %v2649_v55 }
 0xd6c   : > { %3436 = vmatpush3.msra.mxu1 %v2649_v55 }
 0xd6d   : > { %3437 = vmatprep.subr.mxu1 %v2648_v56 }
 0xd6e   : > { %3438 = vmatpush3.msra.mxu1 %v2648_v56 }
 0xd6f   : > { %3439 = vmatprep.subr.mxu1 %v2647_v57 }
 0xd70   : > { %3440 = vmatpush3.msra.mxu1 %v2647_v57 }
 0xd71   : > { %3441 = vmatprep.subr.mxu1 %v2646_v58 }
 0xd72   : > { %3442 = vmatpush3.msra.mxu1 %v2646_v58 }
 0xd73   : > { %3443 = vmatprep.subr.mxu1 %v2645_v2 }
 0xd74   : > { %3444 = vmatpush3.msra.mxu1 %v2645_v2 }
 0xd75   : > { %3445 = vmatprep.subr.mxu1 %v2644_v59 }
 0xd76   : > { %3446 = vmatpush3.msra.mxu1 %v2644_v59 }
 0xd77   : > { %3447 = vmatprep.subr.mxu1 %v2643_v60 }
 0xd78   : > { %3448 = vmatpush3.msra.mxu1 %v2643_v60 }
 0xde3   : > { %v2604_v17 = vpop.xlane.xlu0 %2603 }
 0xde4   : > { %v2606_v19 = vmul.f32 0.03125, %v2604_v17 }
 0xde5   : > { %v2602_v18 = vpop.xlane.xlu1 %2601 }
 0xde6   : > { %v2605_v20 = vmul.f32 0.03125, %v2602_v18  ;;  %v2616_v6 = vmul.f32 %v2606_v19, %v2606_v19  ;;  %v2620_v33 = vsub.f32 %v4403_v45, %v2606_v19  ;;  %v3173_v19 = vld [vmem:[%s704_s14] ss:$0 sm:$0xff] }
 0xde7   : > { %v2610_v21 = vpop.xlane.xlu0 %2609 }
 0xde8   : > { %v2615_v22 = vmul.f32 %v2605_v20, %v2605_v20  ;;  %v2613_v23 = vmul.f32 0.03125, %v2610_v21  ;;  %v2619_v30 = vsub.f32 %v4406_v47, %v2605_v20 }
 0xde9   : > { %v2612_v24 = vpop.xlane.xlu1 %2611 }
 0xdea   : > { %v2617_v25 = vsub.f32 %v2613_v23, %v2615_v22  ;;  %v2614_v26 = vmul.f32 0.03125, %v2612_v24 }
 0xdec   : > { %v2621_v27 = vadd.f32 1e-05, %v2617_v25  ;;  %v2618_v28 = vsub.f32 %v2614_v26, %v2616_v6 }
 0xdee   : > { %3600 = vrsqrt.f32 %v2621_v27  ;;  %v2622_v29 = vadd.f32 1e-05, %v2618_v28 }
 0xdf0   : > { %3602 = vrsqrt.f32 %v2622_v29 }
 0xdfb   : > { %v3601_v31 = vpop.eup %3600 }
 0xdfc   : > { %v2625_v34 = vmul.f32 %v3601_v31, %v2619_v30 }
 0xdfd   : > { %v3603_v8 = vpop.eup %3602 }
 0xdfe   : > { %v2626_v36 = vmul.f32 %v3603_v8, %v2620_v33  ;;  %v2633_v37 = vmul.f32 %v3168_v32, %v2625_v34 }
 0xe00   : > { %v2634_v38 = vmul.f32 %v3168_v32, %v2626_v36  ;;  %v2641_v39 = vadd.f32 %v3169_v35, %v2633_v37 }
 0xe02   : > { %v2642_v10 = vadd.f32 %v3169_v35, %v2634_v38  ;;  %3449 = vmatprep.mubr.f32.mxu1 %v2641_v39 }
 0xe04   : > { %3450 = vmatmul.mubr.f32.vlgmr.msra.gmra.mxu1 %v2642_v10 }
 0xec4   : > { %v3451_v45 = vpop.f32.mrf.mxu1 }
 0xec5   : > { %v2738_v46 = vadd.f32 %v3451_v45, %v3170_v44 }
 0xec6   : > { %v2732_v47 = vpop.f32.mrf.mxu1 }
 0xec7   : > { %v2733_v48 = vadd.f32 %v3170_v44, %v2732_v47  ;;  %v2742_v49 = vmax.f32 %v2738_v46, 0.0 }
 0xec9   : > { %v2741_v50 = vmax.f32 %v2733_v48, 0.0 }
 0xecb   : > { %3484 = vmatprep.mubr.f32.mxu0 %v2741_v50 }
 0xecc   : > { %3485 = vmatmul.mubr.f32.vlgmr.msra.gmra.mxu0 %v2742_v49 }
 0xf8c   : > { %v3486_v51 = vpop.f32.mrf.mxu0 }
 0xf8d   : > { %v2838_v52 = vadd.f32 %v3486_v51, %v3171_v16 }
 0xf8e   : > { %v2832_v53 = vpop.f32.mrf.mxu0 }
 0xf8f   : > { %v2842_v0 = vadd.f32 %v2838_v52, %v2642_v10  ;;  %v2833_v4 = vadd.f32 %v3171_v16, %v2832_v53 }
 0xf91   : > { %v2841_v5 = vadd.f32 %v2833_v4, %v2641_v39  ;;  %2847 = vadd.xlane.f32.xlu1 %v2842_v0  ;;  %v2852_v54 = vmul.f32 %v2842_v0, %v2842_v0 }
 0xf93   : > { %2845 = vadd.xlane.f32.xlu0 %v2841_v5  ;;  %v2851_v55 = vmul.f32 %v2841_v5, %v2841_v5 }
 0xf95   : > { %2855 = vadd.xlane.f32.xlu1 %v2852_v54 }
 0xf97   : > { %2853 = vadd.xlane.f32.xlu0 %v2851_v55 }
0x101a   : > { %v2848_v56 = vpop.xlane.xlu1 %2847 }
0x101b   : > { %v2850_v57 = vmul.f32 0.03125, %v2848_v56 }
0x101c   : > { %v2846_v58 = vpop.xlane.xlu0 %2845 }
0x101d   : > { %v2849_v2 = vmul.f32 0.03125, %v2846_v58  ;;  %v2860_v60 = vmul.f32 %v2850_v57, %v2850_v57  ;;  %v2864_v12 = vsub.f32 %v2842_v0, %v2850_v57 }
0x101e   : > { %v2856_v59 = vpop.xlane.xlu1 %2855 }
0x101f   : > { %v2858_v61 = vmul.f32 0.03125, %v2856_v59  ;;  %v2859_v63 = vmul.f32 %v2849_v2, %v2849_v2  ;;  %v2863_v15 = vsub.f32 %v2841_v5, %v2849_v2 }
0x1020   : > { %v2854_v62 = vpop.xlane.xlu0 %2853 }
0x1021   : > { %v2862_v1 = vsub.f32 %v2858_v61, %v2860_v60  ;;  %v2857_v3 = vmul.f32 0.03125, %v2854_v62 }
0x1023   : > { %v2866_v7 = vadd.f32 1e-05, %v2862_v1  ;;  %v2861_v9 = vsub.f32 %v2857_v3, %v2859_v63 }
0x1025   : > { %3604 = vrsqrt.f32 %v2866_v7  ;;  %v2865_v11 = vadd.f32 1e-05, %v2861_v9 }
0x1027   : > { %3606 = vrsqrt.f32 %v2865_v11 }
0x1032   : > { %v3605_v13 = vpop.eup %3604 }
0x1033   : > { %v2870_v17 = vmul.f32 %v3605_v13, %v2864_v12 }
0x1034   : > { %v3607_v18 = vpop.eup %3606 }
0x1035   : > { %v2878_v20 = vmul.f32 %v3172_v14, %v2870_v17  ;;  %v2869_v21 = vmul.f32 %v3607_v18, %v2863_v15 }
0x1037   : > { %v2886_v22 = vadd.f32 %v3173_v19, %v2878_v20  ;;  %v2877_v23 = vmul.f32 %v3172_v14, %v2869_v21  ;;  %2892 = sbr.rel (%p3174_p9) target bundleno = 4158 (0x103e), region = 96 }
0x1039   : > { %2888 = vst [vmem:[#allocation2 + $0x8] sm:$0xff] %v2886_v22  ;;  %v2885_v24 = vadd.f32 %v3173_v19, %v2877_v23 }
0x103b   : > { %2887 = vst [vmem:[#allocation2] sm:$0xff] %v2885_v24 }
0x103c   : > { %2893 = vst [vmem:[#allocation11] sm:$0x1] %v2885_v24  ;;  %2894 = vst [vmem:[#allocation12 - $0x1] sm:$0x2] %v2885_v24 }
0x103d   : > { %2895 = vst [vmem:[#allocation11 + $0x1] sm:$0x1] %v2886_v22  ;;  %2896 = vst [vmem:[#allocation12] sm:$0x2] %v2886_v22 }
0x103e PF: > { %p3521_p11 = scmp.eq.s32.totalorder %s3929_s17, 1  ;;  %s3833_s13 = smov [#allocation11]  }
0x103f   : > { %s2904_s26 = sshll.u32 %s3833_s13, 4  ;;  %s3834_s14 = smov [#allocation12]   ;;  %s2905_s26 = int_to_ptr.vmem [resolvable:$true] %s2904_s26 }
0x1040   : > { %s2915_s27 = sshll.u32 %s3834_s14, 4  ;;  %s3720_s24 = scalar_lea.vmem %s2905_s26, 32  ;;  %s2916_s27 = int_to_ptr.vmem [resolvable:$true] %s2915_s27 }
0x1041   : > { %p3721_p12 = scmp.ne.s32.totalorder %s2905_s26, %s3720_s24  ;;  %p3727_p1 = scmp.lt.s32.totalorder %s2905_s26, %s2905_s26 }
0x1042   : > { %p3728_p7 = scmp.lt.s32.totalorder %s3720_s24, %s3720_s24 }
0x1043   : > { %p3722_p13 = pnand %p3721_p12, %p3521_p11 }
0x1044   : > { %p3729_p2 = por %p3728_p7, %p3727_p1 }
0x1045   : > { %p3723_p0 = pneg %p3722_p13 }
0x1047   : > { %p3730_p3 = pnand %p3729_p2, %p3723_p0 }
0x1049   : > { %3733 = shalt.err (!%p3730_p3)
}
0x104a   : > { %s4571_s18 = sld [smem:[#allocation29_spill]]  ;;  %s3744_s22 = scalar_lea.vmem %s2916_s27, 32 }
0x104b   : > { %p3745_p4 = scmp.ne.s32.totalorder %s2916_s27, %s3744_s22  ;;  %p3751_p8 = scmp.lt.s32.totalorder %s2916_s27, %s2916_s27 }
0x104c   : > { %p3752_p6 = scmp.lt.s32.totalorder %s3744_s22, %s3744_s22 }
0x104d   : > { %p3746_p10 = pnand %p3745_p4, %p3521_p11 }
0x104e   : > { %p3753_p9 = por %p3752_p6, %p3751_p8 }
0x104f   : > { %p3747_p5 = pneg %p3746_p10 }
0x1050   : > { %3500 = dma.vmem_to_hbm [thread:$0]  (%p3521_p11), %s2905_s26, 32, %s4571_s18, [#allocation5]  }
0x1051   : > { %p3754_p12 = pnand %p3753_p9, %p3747_p5 }
0x1053   : > { %3757 = shalt.err (!%p3754_p12)
}
0x1054   : > { %s4572_s12 = sld [smem:[#allocation30_spill]] }
0x105a   : > { %3502 = dma.vmem_to_hbm [thread:$0]  (%p3521_p11), %s2916_s27, 32, %s4572_s12, [#allocation13]  }
0x105b   : > { %3797 = dma.done.wait (%p3521_p11), [#allocation5], 32  }
0x105c   : > { %3799 = vsyncadd (%p3521_p11), [#allocation5], 4294967264 }
0x105d   : > { %3801 = dma.done.wait (%p3521_p11), [#allocation13], 32  }
0x105e   : > { %3803 = vsyncadd (%p3521_p11), [#allocation13], 4294967264 }
0x105f PF: > { %s4573_s16 = sld [smem:[#allocation20_spill]]  ;;  %s4576_s29 = smov %s3810_s30 }
0x1060   : > { %s4574_s25 = sld [smem:[#allocation19_spill]] }
0x1061   : > { %s4575_s15 = sld [smem:[#allocation21_spill]] }
0x1065   : > { %p33_p13 = scmp.ge.s32.totalorder %s4573_s16, 4  }
0x1066   : > { %s4577_s30 = smov %s4574_s25 }
0x1067   :  { %35 = sbr.rel (!%p33_p13) target bundleno = 19 (0x13), region = 186 }
0x106c   :  { %2932 = vsyncpa [#allocation4], 1 }
0x106d   :  { %2934 = vsyncpa [#allocation4 + $0x1], 1 }
0x106e   :  { %2935 = vsyncpa [#allocation7], 1 }
0x106f   :  { %2937 = vsyncpa [#allocation7 + $0x1], 1 }
0x1070   :  { %2938 = vsyncpa [#allocation10], 1 }
0x1071   :  { %2940 = vsyncpa [#allocation10 + $0x1], 1 }
0x1072   :  { %2941 = vsyncpa [#allocation5], 1 }
0x1073   :  { %2943 = vsyncpa [#allocation5 + $0x1], 1 }
0x1074   :  { %2944 = vsyncpa [#allocation13], 1 }

</bundles_post_ra>
